<compile_context>
chip_gen: v5e
topology: v5e:2x2
jax: 0.10.0
libtpu: 0.0.40
codegen_flags: <defaults>
</compile_context>

<pallas_src>
import functools

import numpy as np
import jax
import jax.numpy as jnp
from jax import lax
from jax.experimental import pallas as pl
from jax.experimental.pallas import tpu as pltpu

EPS = 1e-5


def _round_up(v, m):
    return ((v + m - 1) // m) * m


def _build_tap_masks(n, h, w, c, ksize, kp):
    """(kp, M) f32 validity masks, pre-broadcast to the col row layout.

    Rows [tap*c, tap*c + c) hold tap's boundary mask; tail rows [KK*c, kp) are zero.
    Built host-side (numpy) -> baked constant, so the kernel does plain loads
    instead of per-tap sublane broadcasts.
    """
    p = ksize // 2
    m = np.arange(n * h * w)
    y = (m % (h * w)) // w
    x = m % w
    out = np.zeros((kp, n * h * w), np.float32)
    for kh in range(ksize):
        for kw in range(ksize):
            dh, dw = kh - p, kw - p
            valid = ((y + dh >= 0) & (y + dh < h) &
                     (x + dw >= 0) & (x + dw < w)).astype(np.float32)
            tap = kh * ksize + kw
            out[tap * c:tap * c + c, :] = valid[None, :]
    return jnp.asarray(out)


def _resblock_kernel(x_ref, w_ref, bn_ref, mask_ref, o_ref, col_ref, *,
                     width, ksize, kp):
    """Fused ResBlock forward, all operands VMEM resident.

    x_ref    : (C, M) f32       activations, M = N*H*W on lanes
    w_ref    : (2, C, kp) bf16  packed conv weights (tail columns are zero)
    bn_ref   : (C, 4) f32       columns = [gamma1, beta1, gamma2, beta2]
    mask_ref : (kp, M) f32      pre-broadcast per-tap boundary masks
    o_ref    : (C, M) f32       output (lane-dense store)
    col_ref  : (kp, M) bf16     densely packed im2col scratch (shared by both convs)
    """
    C, M = x_ref.shape
    KK = ksize * ksize
    P = ksize // 2
    inv_m = 1.0 / M
    cdtype = col_ref.dtype

    # Zero ONLY the contiguous tail padding rows [KK*C, kp).  Their weight columns
    # are zero, but 0 * uninit-NaN = NaN, so they must be finite.  All data rows are
    # fully rewritten by the tap loop of each conv.
    pad_rows = kp - KK * C
    if pad_rows:
        col_ref[pl.ds(KK * C, pad_rows), :] = jnp.zeros((pad_rows, M), cdtype)

    # Row-sum reductions go through the MXU (nearly idle at Cout=C) instead of the
    # contended XLU.  Built once, reused by both convs.
    ones_m = jnp.ones((M, 1), jnp.float32)

    def conv_bn_relu(inp, conv_idx):
        # ---- im2col via lane rotation + boundary masks (densely packed taps) ----
        for kh in range(ksize):
            for kw in range(ksize):
                tap = kh * ksize + kw
                d = (kh - P) * width + (kw - P)      # flat-index shift of this tap
                row = tap * C
                if d == 0:
                    # center tap: mask is all-ones, skip the multiply entirely.
                    col_ref[pl.ds(row, C), :] = inp.astype(cdtype)
                else:
                    # shifted[:, m] = inp[:, (m + d) % M]; wrapped lanes are masked.
                    shifted = pltpu.roll(inp, (-d) % M, 1)
                    col_ref[pl.ds(row, C), :] = (
                        shifted * mask_ref[pl.ds(row, C), :]).astype(cdtype)

        # ---- one bf16 MXU matmul per conv: (C, kp) @ (kp, M) -> (C, M) f32 ----
        acc = jnp.dot(w_ref[conv_idx], col_ref[...],
                      preferred_element_type=jnp.float32)

        # ---- fused training-mode BatchNorm (single pass, f32 stats) + ReLU ----
        # conv bias omitted: the batch-mean subtraction cancels it exactly.
        mean = jnp.dot(acc, ones_m, preferred_element_type=jnp.float32) * inv_m
        ex2 = jnp.dot(acc * acc, ones_m, preferred_element_type=jnp.float32) * inv_m
        var = ex2 - mean * mean                                   # biased variance
        gamma = bn_ref[:, 2 * conv_idx:2 * conv_idx + 1]          # (C, 1)
        beta = bn_ref[:, 2 * conv_idx + 1:2 * conv_idx + 2]       # (C, 1)
        scale = gamma * lax.rsqrt(var + EPS)
        shift = beta - mean * scale
        return jnp.maximum(acc * scale + shift, 0.0)

    h1 = conv_bn_relu(x_ref[...], 0)
    h2 = conv_bn_relu(h1, 1)
    o_ref[...] = x_ref[...] + h2             # residual add, lane-dense store


def _pack_params(params, C, ksize, kp):
    """Pack PyTorch-layout parameters into the kernel's operand layouts."""
    w1, b1, g1, be1, w2, b2, g2, be2 = params
    # b1 / b2 intentionally unused: training-mode BN cancels the conv bias exactly.
    KK = ksize * ksize

    def pack_w(wk):   # OIHW (Cout, Cin, K, K) -> (Cout, kp) bf16, [tap, cin] columns
        wt = jnp.transpose(wk, (0, 2, 3, 1)).reshape(C, KK * C)
        wt = jnp.pad(wt, ((0, 0), (0, kp - KK * C)))
        return wt.astype(jnp.bfloat16)

    w_all = jnp.stack([pack_w(w1), pack_w(w2)])                        # (2, C, kp)
    bn_all = jnp.stack([g1, be1, g2, be2], axis=1).astype(jnp.float32)  # (C, 4)
    return w_all, bn_all


def resblock_pallas_cm(x_cm, w_all, bn_all, tap_mask, *, width, ksize, kp):
    """(C, M) lane-dense in / out.  Chain multiple ResBlocks through this entry point
    to keep activations lane-dense and skip per-block NCHW<->(C, M) HBM relayouts."""
    C, M = x_cm.shape
    kern = functools.partial(_resblock_kernel, width=width, ksize=ksize, kp=kp)
    vmem = pl.BlockSpec(memory_space=pltpu.MemorySpace.VMEM)
    return pl.pallas_call(
        kern,
        out_shape=jax.ShapeDtypeStruct((C, M), jnp.float32),
        in_specs=[vmem] * 4,
        out_specs=vmem,
        scratch_shapes=[pltpu.VMEM((kp, M), jnp.bfloat16)],
    )(x_cm, w_all, bn_all, tap_mask)


def resblock_pallas(x_nchw, params, ksize):
    """Wrapper: PyTorch NCHW / OIHW conventions in and out, (C, M) inside."""
    N, C, H, W = x_nchw.shape
    M = N * H * W
    KK = ksize * ksize
    kp = _round_up(KK * C, 16)        # bf16 sublane-tile aligned contraction depth

    w_all, bn_all = _pack_params(params, C, ksize, kp)
    tap_mask = _build_tap_masks(N, H, W, C, ksize, kp)      # (kp, M) baked constant

    x_cm = jnp.transpose(x_nchw, (1, 0, 2, 3)).reshape(C, M).astype(jnp.float32)
    out_cm = resblock_pallas_cm(x_cm, w_all, bn_all, tap_mask,
                                width=W, ksize=ksize, kp=kp)
    return jnp.transpose(out_cm.reshape(C, N, H, W), (1, 0, 2, 3))   # -> NCHW


def resblock_ref(x_nchw, params, ksize):
    """Pure-JAX f32 reference (same math as the PyTorch module in train mode)."""
    x = jnp.transpose(x_nchw, (0, 2, 3, 1))
    w1, b1, g1, be1, w2, b2, g2, be2 = params

    def block(h, wk, b, g, be):
        y = lax.conv_general_dilated(
            h, jnp.transpose(wk, (2, 3, 1, 0)),      # OIHW -> HWIO
            window_strides=(1, 1), padding='SAME',
            dimension_numbers=('NHWC', 'HWIO', 'NHWC'))
        y = y + b.reshape(1, 1, 1, -1)
        mean = jnp.mean(y, axis=(0, 1, 2), keepdims=True)
        var = jnp.mean((y - mean) ** 2, axis=(0, 1, 2), keepdims=True)
        y = (y - mean) * lax.rsqrt(var + EPS) * g.reshape(1, 1, 1, -1) \
            + be.reshape(1, 1, 1, -1)
        return jnp.maximum(y, 0.0)

    h = block(x, w1, b1, g1, be1)
    h = block(h, w2, b2, g2, be2)
    return jnp.transpose(x + h, (0, 3, 1, 2))


if __name__ == "__main__":
    key = jax.random.PRNGKey(0)
    N, C, H, W, K = 2, 4, 16, 16, 3    # ResBlock(n_channels=4, kernel_size=3)

    ks = jax.random.split(key, 9)
    x = jax.random.normal(ks[0], (N, C, H, W), jnp.float32)
    # parameters in PyTorch layouts (Conv2d weight OIHW)
    w1 = 0.1 * jax.random.normal(ks[1], (C, C, K, K), jnp.float32)
    b1 = 0.1 * jax.random.normal(ks[2], (C,), jnp.float32)
    g1 = 1.0 + 0.1 * jax.random.normal(ks[3], (C,), jnp.float32)
    be1 = 0.1 * jax.random.normal(ks[4], (C,), jnp.float32)
    w2 = 0.1 * jax.random.normal(ks[5], (C, C, K, K), jnp.float32)
    b2 = 0.1 * jax.random.normal(ks[6], (C,), jnp.float32)
    g2 = 1.0 + 0.1 * jax.random.normal(ks[7], (C,), jnp.float32)
    be2 = 0.1 * jax.random.normal(ks[8], (C,), jnp.float32)
    params = (w1, b1, g1, be1, w2, b2, g2, be2)

    run = jax.jit(resblock_pallas, static_argnums=2)
    out = jax.block_until_ready(run(x, params, K))

    ref = resblock_ref(x, params, K)
    err = float(jnp.max(jnp.abs(out - ref)))
    # Tolerance reflects the deliberate bf16 conv-matmul inputs (f32 accumulation,
    # f32 BN statistics); the f32 reference is the exact module semantics.
    assert jnp.allclose(out, ref, atol=5e-2, rtol=5e-2), f"max abs err {err}"

    print("KERNEL_OK")
</pallas_src>

<mosaic_0001>
module attributes {stable_mosaic.version = 11 : i64} {
  func.func @_resblock_kernel(%arg0: memref<4x512xf32, #tpu.memory_space<vmem>>, %arg1: memref<2x4x48xbf16, #tpu.memory_space<vmem>>, %arg2: memref<4x4xf32, #tpu.memory_space<vmem>>, %arg3: memref<48x512xf32, #tpu.memory_space<vmem>>, %arg4: memref<4x512xf32, #tpu.memory_space<vmem>>, %arg5: memref<48x512xbf16, #tpu.memory_space<vmem>>) attributes {dimension_semantics = [], scalar_prefetch = 0 : i64, scratch_operands = 1 : i64, tpu.core_type = #tpu.core_type<tc>} {
    %cst = arith.constant 0.000000e+00 : bf16
    %0 = vector.broadcast %cst : bf16 to vector<12x512xbf16>
    %c36 = arith.constant 36 : index
    %c0 = arith.constant 0 : index
    %1 = vector.load %arg5[%c36, %c0] : memref<48x512xbf16, #tpu.memory_space<vmem>>, vector<12x512xbf16>
    tpu.vector_store %arg5[%c36, %c0], %0 {strides = array<i32>} : memref<48x512xbf16, #tpu.memory_space<vmem>>, vector<12x512xbf16>,
    %cst_0 = arith.constant 1.000000e+00 : f32
    %2 = vector.broadcast %cst_0 : f32 to vector<512x1xf32>
    %c0_1 = arith.constant 0 : index
    %c0_2 = arith.constant 0 : index
    %3 = vector.load %arg0[%c0_1, %c0_2] : memref<4x512xf32, #tpu.memory_space<vmem>>, vector<4x512xf32>
    %c17_i32 = arith.constant 17 : i32
    %4 = tpu.dynamic_rotate %3 by %c17_i32 dim 1 : vector<4x512xf32>, i32 -> vector<4x512xf32>
    %c0_3 = arith.constant 0 : index
    %c0_4 = arith.constant 0 : index
    %5 = vector.load %arg3[%c0_3, %c0_4] : memref<48x512xf32, #tpu.memory_space<vmem>>, vector<4x512xf32>
    %6 = arith.mulf %4, %5 : vector<4x512xf32>
    %7 = arith.truncf %6 : vector<4x512xf32> to vector<4x512xbf16>
    %c0_5 = arith.constant 0 : index
    %c0_6 = arith.constant 0 : index
    %8 = vector.load %arg5[%c0_5, %c0_6] : memref<48x512xbf16, #tpu.memory_space<vmem>>, vector<4x512xbf16>
    tpu.vector_store %arg5[%c0_5, %c0_6], %7 {strides = array<i32>} : memref<48x512xbf16, #tpu.memory_space<vmem>>, vector<4x512xbf16>,
    %c16_i32 = arith.constant 16 : i32
    %9 = tpu.dynamic_rotate %3 by %c16_i32 dim 1 : vector<4x512xf32>, i32 -> vector<4x512xf32>
    %c4 = arith.constant 4 : index
    %c0_7 = arith.constant 0 : index
    %10 = vector.load %arg3[%c4, %c0_7] : memref<48x512xf32, #tpu.memory_space<vmem>>, vector<4x512xf32>
    %11 = arith.mulf %9, %10 : vector<4x512xf32>
    %12 = arith.truncf %11 : vector<4x512xf32> to vector<4x512xbf16>
    %c4_8 = arith.constant 4 : index
    %c0_9 = arith.constant 0 : index
    %13 = vector.load %arg5[%c4_8, %c0_9] : memref<48x512xbf16, #tpu.memory_space<vmem>>, vector<4x512xbf16>
    tpu.vector_store %arg5[%c4_8, %c0_9], %12 {strides = array<i32>} : memref<48x512xbf16, #tpu.memory_space<vmem>>, vector<4x512xbf16>,
    %c15_i32 = arith.constant 15 : i32
    %14 = tpu.dynamic_rotate %3 by %c15_i32 dim 1 : vector<4x512xf32>, i32 -> vector<4x512xf32>
    %c8 = arith.constant 8 : index
    %c0_10 = arith.constant 0 : index
    %15 = vector.load %arg3[%c8, %c0_10] : memref<48x512xf32, #tpu.memory_space<vmem>>, vector<4x512xf32>
    %16 = arith.mulf %14, %15 : vector<4x512xf32>
    %17 = arith.truncf %16 : vector<4x512xf32> to vector<4x512xbf16>
    %c8_11 = arith.constant 8 : index
    %c0_12 = arith.constant 0 : index
    %18 = vector.load %arg5[%c8_11, %c0_12] : memref<48x512xbf16, #tpu.memory_space<vmem>>, vector<4x512xbf16>
    tpu.vector_store %arg5[%c8_11, %c0_12], %17 {strides = array<i32>} : memref<48x512xbf16, #tpu.memory_space<vmem>>, vector<4x512xbf16>,
    %c1_i32 = arith.constant 1 : i32
    %19 = tpu.dynamic_rotate %3 by %c1_i32 dim 1 : vector<4x512xf32>, i32 -> vector<4x512xf32>
    %c12 = arith.constant 12 : index
    %c0_13 = arith.constant 0 : index
    %20 = vector.load %arg3[%c12, %c0_13] : memref<48x512xf32, #tpu.memory_space<vmem>>, vector<4x512xf32>
    %21 = arith.mulf %19, %20 : vector<4x512xf32>
    %22 = arith.truncf %21 : vector<4x512xf32> to vector<4x512xbf16>
    %c12_14 = arith.constant 12 : index
    %c0_15 = arith.constant 0 : index
    %23 = vector.load %arg5[%c12_14, %c0_15] : memref<48x512xbf16, #tpu.memory_space<vmem>>, vector<4x512xbf16>
    tpu.vector_store %arg5[%c12_14, %c0_15], %22 {strides = array<i32>} : memref<48x512xbf16, #tpu.memory_space<vmem>>, vector<4x512xbf16>,
    %24 = arith.truncf %3 : vector<4x512xf32> to vector<4x512xbf16>
    %c16 = arith.constant 16 : index
    %c0_16 = arith.constant 0 : index
    %25 = vector.load %arg5[%c16, %c0_16] : memref<48x512xbf16, #tpu.memory_space<vmem>>, vector<4x512xbf16>
    tpu.vector_store %arg5[%c16, %c0_16], %24 {strides = array<i32>} : memref<48x512xbf16, #tpu.memory_space<vmem>>, vector<4x512xbf16>,
    %c511_i32 = arith.constant 511 : i32
    %26 = tpu.dynamic_rotate %3 by %c511_i32 dim 1 : vector<4x512xf32>, i32 -> vector<4x512xf32>
    %c20 = arith.constant 20 : index
    %c0_17 = arith.constant 0 : index
    %27 = vector.load %arg3[%c20, %c0_17] : memref<48x512xf32, #tpu.memory_space<vmem>>, vector<4x512xf32>
    %28 = arith.mulf %26, %27 : vector<4x512xf32>
    %29 = arith.truncf %28 : vector<4x512xf32> to vector<4x512xbf16>
    %c20_18 = arith.constant 20 : index
    %c0_19 = arith.constant 0 : index
    %30 = vector.load %arg5[%c20_18, %c0_19] : memref<48x512xbf16, #tpu.memory_space<vmem>>, vector<4x512xbf16>
    tpu.vector_store %arg5[%c20_18, %c0_19], %29 {strides = array<i32>} : memref<48x512xbf16, #tpu.memory_space<vmem>>, vector<4x512xbf16>,
    %c497_i32 = arith.constant 497 : i32
    %31 = tpu.dynamic_rotate %3 by %c497_i32 dim 1 : vector<4x512xf32>, i32 -> vector<4x512xf32>
    %c24 = arith.constant 24 : index
    %c0_20 = arith.constant 0 : index
    %32 = vector.load %arg3[%c24, %c0_20] : memref<48x512xf32, #tpu.memory_space<vmem>>, vector<4x512xf32>
    %33 = arith.mulf %31, %32 : vector<4x512xf32>
    %34 = arith.truncf %33 : vector<4x512xf32> to vector<4x512xbf16>
    %c24_21 = arith.constant 24 : index
    %c0_22 = arith.constant 0 : index
    %35 = vector.load %arg5[%c24_21, %c0_22] : memref<48x512xbf16, #tpu.memory_space<vmem>>, vector<4x512xbf16>
    tpu.vector_store %arg5[%c24_21, %c0_22], %34 {strides = array<i32>} : memref<48x512xbf16, #tpu.memory_space<vmem>>, vector<4x512xbf16>,
    %c496_i32 = arith.constant 496 : i32
    %36 = tpu.dynamic_rotate %3 by %c496_i32 dim 1 : vector<4x512xf32>, i32 -> vector<4x512xf32>
    %c28 = arith.constant 28 : index
    %c0_23 = arith.constant 0 : index
    %37 = vector.load %arg3[%c28, %c0_23] : memref<48x512xf32, #tpu.memory_space<vmem>>, vector<4x512xf32>
    %38 = arith.mulf %36, %37 : vector<4x512xf32>
    %39 = arith.truncf %38 : vector<4x512xf32> to vector<4x512xbf16>
    %c28_24 = arith.constant 28 : index
    %c0_25 = arith.constant 0 : index
    %40 = vector.load %arg5[%c28_24, %c0_25] : memref<48x512xbf16, #tpu.memory_space<vmem>>, vector<4x512xbf16>
    tpu.vector_store %arg5[%c28_24, %c0_25], %39 {strides = array<i32>} : memref<48x512xbf16, #tpu.memory_space<vmem>>, vector<4x512xbf16>,
    %c495_i32 = arith.constant 495 : i32
    %41 = tpu.dynamic_rotate %3 by %c495_i32 dim 1 : vector<4x512xf32>, i32 -> vector<4x512xf32>
    %c32 = arith.constant 32 : index
    %c0_26 = arith.constant 0 : index
    %42 = vector.load %arg3[%c32, %c0_26] : memref<48x512xf32, #tpu.memory_space<vmem>>, vector<4x512xf32>
    %43 = arith.mulf %41, %42 : vector<4x512xf32>
    %44 = arith.truncf %43 : vector<4x512xf32> to vector<4x512xbf16>
    %c32_27 = arith.constant 32 : index
    %c0_28 = arith.constant 0 : index
    %45 = vector.load %arg5[%c32_27, %c0_28] : memref<48x512xbf16, #tpu.memory_space<vmem>>, vector<4x512xbf16>
    tpu.vector_store %arg5[%c32_27, %c0_28], %44 {strides = array<i32>} : memref<48x512xbf16, #tpu.memory_space<vmem>>, vector<4x512xbf16>,
    %c0_29 = arith.constant 0 : index
    %c0_30 = arith.constant 0 : index
    %c0_31 = arith.constant 0 : index
    %46 = vector.load %arg1[%c0_29, %c0_30, %c0_31] : memref<2x4x48xbf16, #tpu.memory_space<vmem>>, vector<1x4x48xbf16>
    %47 = vector.shape_cast %46 : vector<1x4x48xbf16> to vector<4x48xbf16>
    %c0_32 = arith.constant 0 : index
    %c0_33 = arith.constant 0 : index
    %48 = vector.load %arg5[%c0_32, %c0_33] : memref<48x512xbf16, #tpu.memory_space<vmem>>, vector<48x512xbf16>
    %cst_34 = arith.constant dense<0.000000e+00> : vector<4x512xf32>
    %49 = tpu.matmul %47, %48, %cst_34 {dimension_numbers = #tpu.dot_dimension_numbers<[1], [0], [0], [1], [0, 0, 1, 1], [], []>} : vector<4x48xbf16>, vector<48x512xbf16>, vector<4x512xf32> -> vector<4x512xf32>
    %cst_35 = arith.constant dense<0.000000e+00> : vector<4x1xf32>
    %50 = tpu.matmul %49, %2, %cst_35 {dimension_numbers = #tpu.dot_dimension_numbers<[1], [0], [0], [1], [0, 0, 1, 1], [], []>} : vector<4x512xf32>, vector<512x1xf32>, vector<4x1xf32> -> vector<4x1xf32>
    %cst_36 = arith.constant 0.001953125 : f32
    %51 = vector.broadcast %cst_36 : f32 to vector<4x1xf32>
    %52 = arith.mulf %50, %51 : vector<4x1xf32>
    %53 = arith.mulf %49, %49 : vector<4x512xf32>
    %cst_37 = arith.constant dense<0.000000e+00> : vector<4x1xf32>
    %54 = tpu.matmul %53, %2, %cst_37 {dimension_numbers = #tpu.dot_dimension_numbers<[1], [0], [0], [1], [0, 0, 1, 1], [], []>} : vector<4x512xf32>, vector<512x1xf32>, vector<4x1xf32> -> vector<4x1xf32>
    %cst_38 = arith.constant 0.001953125 : f32
    %55 = vector.broadcast %cst_38 : f32 to vector<4x1xf32>
    %56 = arith.mulf %54, %55 : vector<4x1xf32>
    %57 = arith.mulf %52, %52 : vector<4x1xf32>
    %58 = arith.subf %56, %57 : vector<4x1xf32>
    %c0_39 = arith.constant 0 : index
    %c0_40 = arith.constant 0 : index
    %59 = vector.load %arg2[%c0_39, %c0_40] : memref<4x4xf32, #tpu.memory_space<vmem>>, vector<4x1xf32>
    %c0_41 = arith.constant 0 : index
    %c1 = arith.constant 1 : index
    %60 = vector.load %arg2[%c0_41, %c1] : memref<4x4xf32, #tpu.memory_space<vmem>>, vector<4x1xf32>
    %cst_42 = arith.constant 9.99999974E-6 : f32
    %61 = vector.broadcast %cst_42 : f32 to vector<4x1xf32>
    %62 = arith.addf %58, %61 : vector<4x1xf32>
    %63 = math.rsqrt %62 : vector<4x1xf32>
    %64 = arith.mulf %59, %63 : vector<4x1xf32>
    %65 = arith.mulf %52, %64 : vector<4x1xf32>
    %66 = arith.subf %60, %65 : vector<4x1xf32>
    %67 = vector.broadcast %64 : vector<4x1xf32> to vector<4x512xf32>
    %68 = arith.mulf %49, %67 : vector<4x512xf32>
    %69 = vector.broadcast %66 : vector<4x1xf32> to vector<4x512xf32>
    %70 = arith.addf %68, %69 : vector<4x512xf32>
    %cst_43 = arith.constant 0.000000e+00 : f32
    %71 = vector.broadcast %cst_43 : f32 to vector<4x512xf32>
    %72 = arith.maximumf %70, %71 : vector<4x512xf32>
    %c17_i32_44 = arith.constant 17 : i32
    %73 = tpu.dynamic_rotate %72 by %c17_i32_44 dim 1 : vector<4x512xf32>, i32 -> vector<4x512xf32>
    %c0_45 = arith.constant 0 : index
    %c0_46 = arith.constant 0 : index
    %74 = vector.load %arg3[%c0_45, %c0_46] : memref<48x512xf32, #tpu.memory_space<vmem>>, vector<4x512xf32>
    %75 = arith.mulf %73, %74 : vector<4x512xf32>
    %76 = arith.truncf %75 : vector<4x512xf32> to vector<4x512xbf16>
    %c0_47 = arith.constant 0 : index
    %c0_48 = arith.constant 0 : index
    %77 = vector.load %arg5[%c0_47, %c0_48] : memref<48x512xbf16, #tpu.memory_space<vmem>>, vector<4x512xbf16>
    tpu.vector_store %arg5[%c0_47, %c0_48], %76 {strides = array<i32>} : memref<48x512xbf16, #tpu.memory_space<vmem>>, vector<4x512xbf16>,
    %c16_i32_49 = arith.constant 16 : i32
    %78 = tpu.dynamic_rotate %72 by %c16_i32_49 dim 1 : vector<4x512xf32>, i32 -> vector<4x512xf32>
    %c4_50 = arith.constant 4 : index
    %c0_51 = arith.constant 0 : index
    %79 = vector.load %arg3[%c4_50, %c0_51] : memref<48x512xf32, #tpu.memory_space<vmem>>, vector<4x512xf32>
    %80 = arith.mulf %78, %79 : vector<4x512xf32>
    %81 = arith.truncf %80 : vector<4x512xf32> to vector<4x512xbf16>
    %c4_52 = arith.constant 4 : index
    %c0_53 = arith.constant 0 : index
    %82 = vector.load %arg5[%c4_52, %c0_53] : memref<48x512xbf16, #tpu.memory_space<vmem>>, vector<4x512xbf16>
    tpu.vector_store %arg5[%c4_52, %c0_53], %81 {strides = array<i32>} : memref<48x512xbf16, #tpu.memory_space<vmem>>, vector<4x512xbf16>,
    %c15_i32_54 = arith.constant 15 : i32
    %83 = tpu.dynamic_rotate %72 by %c15_i32_54 dim 1 : vector<4x512xf32>, i32 -> vector<4x512xf32>
    %c8_55 = arith.constant 8 : index
    %c0_56 = arith.constant 0 : index
    %84 = vector.load %arg3[%c8_55, %c0_56] : memref<48x512xf32, #tpu.memory_space<vmem>>, vector<4x512xf32>
    %85 = arith.mulf %83, %84 : vector<4x512xf32>
    %86 = arith.truncf %85 : vector<4x512xf32> to vector<4x512xbf16>
    %c8_57 = arith.constant 8 : index
    %c0_58 = arith.constant 0 : index
    %87 = vector.load %arg5[%c8_57, %c0_58] : memref<48x512xbf16, #tpu.memory_space<vmem>>, vector<4x512xbf16>
    tpu.vector_store %arg5[%c8_57, %c0_58], %86 {strides = array<i32>} : memref<48x512xbf16, #tpu.memory_space<vmem>>, vector<4x512xbf16>,
    %c1_i32_59 = arith.constant 1 : i32
    %88 = tpu.dynamic_rotate %72 by %c1_i32_59 dim 1 : vector<4x512xf32>, i32 -> vector<4x512xf32>
    %c12_60 = arith.constant 12 : index
    %c0_61 = arith.constant 0 : index
    %89 = vector.load %arg3[%c12_60, %c0_61] : memref<48x512xf32, #tpu.memory_space<vmem>>, vector<4x512xf32>
    %90 = arith.mulf %88, %89 : vector<4x512xf32>
    %91 = arith.truncf %90 : vector<4x512xf32> to vector<4x512xbf16>
    %c12_62 = arith.constant 12 : index
    %c0_63 = arith.constant 0 : index
    %92 = vector.load %arg5[%c12_62, %c0_63] : memref<48x512xbf16, #tpu.memory_space<vmem>>, vector<4x512xbf16>
    tpu.vector_store %arg5[%c12_62, %c0_63], %91 {strides = array<i32>} : memref<48x512xbf16, #tpu.memory_space<vmem>>, vector<4x512xbf16>,
    %93 = arith.truncf %72 : vector<4x512xf32> to vector<4x512xbf16>
    %c16_64 = arith.constant 16 : index
    %c0_65 = arith.constant 0 : index
    %94 = vector.load %arg5[%c16_64, %c0_65] : memref<48x512xbf16, #tpu.memory_space<vmem>>, vector<4x512xbf16>
    tpu.vector_store %arg5[%c16_64, %c0_65], %93 {strides = array<i32>} : memref<48x512xbf16, #tpu.memory_space<vmem>>, vector<4x512xbf16>,
    %c511_i32_66 = arith.constant 511 : i32
    %95 = tpu.dynamic_rotate %72 by %c511_i32_66 dim 1 : vector<4x512xf32>, i32 -> vector<4x512xf32>
    %c20_67 = arith.constant 20 : index
    %c0_68 = arith.constant 0 : index
    %96 = vector.load %arg3[%c20_67, %c0_68] : memref<48x512xf32, #tpu.memory_space<vmem>>, vector<4x512xf32>
    %97 = arith.mulf %95, %96 : vector<4x512xf32>
    %98 = arith.truncf %97 : vector<4x512xf32> to vector<4x512xbf16>
    %c20_69 = arith.constant 20 : index
    %c0_70 = arith.constant 0 : index
    %99 = vector.load %arg5[%c20_69, %c0_70] : memref<48x512xbf16, #tpu.memory_space<vmem>>, vector<4x512xbf16>
    tpu.vector_store %arg5[%c20_69, %c0_70], %98 {strides = array<i32>} : memref<48x512xbf16, #tpu.memory_space<vmem>>, vector<4x512xbf16>,
    %c497_i32_71 = arith.constant 497 : i32
    %100 = tpu.dynamic_rotate %72 by %c497_i32_71 dim 1 : vector<4x512xf32>, i32 -> vector<4x512xf32>
    %c24_72 = arith.constant 24 : index
    %c0_73 = arith.constant 0 : index
    %101 = vector.load %arg3[%c24_72, %c0_73] : memref<48x512xf32, #tpu.memory_space<vmem>>, vector<4x512xf32>
    %102 = arith.mulf %100, %101 : vector<4x512xf32>
    %103 = arith.truncf %102 : vector<4x512xf32> to vector<4x512xbf16>
    %c24_74 = arith.constant 24 : index
    %c0_75 = arith.constant 0 : index
    %104 = vector.load %arg5[%c24_74, %c0_75] : memref<48x512xbf16, #tpu.memory_space<vmem>>, vector<4x512xbf16>
    tpu.vector_store %arg5[%c24_74, %c0_75], %103 {strides = array<i32>} : memref<48x512xbf16, #tpu.memory_space<vmem>>, vector<4x512xbf16>,
    %c496_i32_76 = arith.constant 496 : i32
    %105 = tpu.dynamic_rotate %72 by %c496_i32_76 dim 1 : vector<4x512xf32>, i32 -> vector<4x512xf32>
    %c28_77 = arith.constant 28 : index
    %c0_78 = arith.constant 0 : index
    %106 = vector.load %arg3[%c28_77, %c0_78] : memref<48x512xf32, #tpu.memory_space<vmem>>, vector<4x512xf32>
    %107 = arith.mulf %105, %106 : vector<4x512xf32>
    %108 = arith.truncf %107 : vector<4x512xf32> to vector<4x512xbf16>
    %c28_79 = arith.constant 28 : index
    %c0_80 = arith.constant 0 : index
    %109 = vector.load %arg5[%c28_79, %c0_80] : memref<48x512xbf16, #tpu.memory_space<vmem>>, vector<4x512xbf16>
    tpu.vector_store %arg5[%c28_79, %c0_80], %108 {strides = array<i32>} : memref<48x512xbf16, #tpu.memory_space<vmem>>, vector<4x512xbf16>,
    %c495_i32_81 = arith.constant 495 : i32
    %110 = tpu.dynamic_rotate %72 by %c495_i32_81 dim 1 : vector<4x512xf32>, i32 -> vector<4x512xf32>
    %c32_82 = arith.constant 32 : index
    %c0_83 = arith.constant 0 : index
    %111 = vector.load %arg3[%c32_82, %c0_83] : memref<48x512xf32, #tpu.memory_space<vmem>>, vector<4x512xf32>
    %112 = arith.mulf %110, %111 : vector<4x512xf32>
    %113 = arith.truncf %112 : vector<4x512xf32> to vector<4x512xbf16>
    %c32_84 = arith.constant 32 : index
    %c0_85 = arith.constant 0 : index
    %114 = vector.load %arg5[%c32_84, %c0_85] : memref<48x512xbf16, #tpu.memory_space<vmem>>, vector<4x512xbf16>
    tpu.vector_store %arg5[%c32_84, %c0_85], %113 {strides = array<i32>} : memref<48x512xbf16, #tpu.memory_space<vmem>>, vector<4x512xbf16>,
    %c1_86 = arith.constant 1 : index
    %c0_87 = arith.constant 0 : index
    %c0_88 = arith.constant 0 : index
    %115 = vector.load %arg1[%c1_86, %c0_87, %c0_88] : memref<2x4x48xbf16, #tpu.memory_space<vmem>>, vector<1x4x48xbf16>
    %116 = vector.shape_cast %115 : vector<1x4x48xbf16> to vector<4x48xbf16>
    %c0_89 = arith.constant 0 : index
    %c0_90 = arith.constant 0 : index
    %117 = vector.load %arg5[%c0_89, %c0_90] : memref<48x512xbf16, #tpu.memory_space<vmem>>, vector<48x512xbf16>
    %cst_91 = arith.constant dense<0.000000e+00> : vector<4x512xf32>
    %118 = tpu.matmul %116, %117, %cst_91 {dimension_numbers = #tpu.dot_dimension_numbers<[1], [0], [0], [1], [0, 0, 1, 1], [], []>} : vector<4x48xbf16>, vector<48x512xbf16>, vector<4x512xf32> -> vector<4x512xf32>
    %cst_92 = arith.constant dense<0.000000e+00> : vector<4x1xf32>
    %119 = tpu.matmul %118, %2, %cst_92 {dimension_numbers = #tpu.dot_dimension_numbers<[1], [0], [0], [1], [0, 0, 1, 1], [], []>} : vector<4x512xf32>, vector<512x1xf32>, vector<4x1xf32> -> vector<4x1xf32>
    %cst_93 = arith.constant 0.001953125 : f32
    %120 = vector.broadcast %cst_93 : f32 to vector<4x1xf32>
    %121 = arith.mulf %119, %120 : vector<4x1xf32>
    %122 = arith.mulf %118, %118 : vector<4x512xf32>
    %cst_94 = arith.constant dense<0.000000e+00> : vector<4x1xf32>
    %123 = tpu.matmul %122, %2, %cst_94 {dimension_numbers = #tpu.dot_dimension_numbers<[1], [0], [0], [1], [0, 0, 1, 1], [], []>} : vector<4x512xf32>, vector<512x1xf32>, vector<4x1xf32> -> vector<4x1xf32>
    %cst_95 = arith.constant 0.001953125 : f32
    %124 = vector.broadcast %cst_95 : f32 to vector<4x1xf32>
    %125 = arith.mulf %123, %124 : vector<4x1xf32>
    %126 = arith.mulf %121, %121 : vector<4x1xf32>
    %127 = arith.subf %125, %126 : vector<4x1xf32>
    %c0_96 = arith.constant 0 : index
    %c2 = arith.constant 2 : index
    %128 = vector.load %arg2[%c0_96, %c2] : memref<4x4xf32, #tpu.memory_space<vmem>>, vector<4x1xf32>
    %c0_97 = arith.constant 0 : index
    %c3 = arith.constant 3 : index
    %129 = vector.load %arg2[%c0_97, %c3] : memref<4x4xf32, #tpu.memory_space<vmem>>, vector<4x1xf32>
    %cst_98 = arith.constant 9.99999974E-6 : f32
    %130 = vector.broadcast %cst_98 : f32 to vector<4x1xf32>
    %131 = arith.addf %127, %130 : vector<4x1xf32>
    %132 = math.rsqrt %131 : vector<4x1xf32>
    %133 = arith.mulf %128, %132 : vector<4x1xf32>
    %134 = arith.mulf %121, %133 : vector<4x1xf32>
    %135 = arith.subf %129, %134 : vector<4x1xf32>
    %136 = vector.broadcast %133 : vector<4x1xf32> to vector<4x512xf32>
    %137 = arith.mulf %118, %136 : vector<4x512xf32>
    %138 = vector.broadcast %135 : vector<4x1xf32> to vector<4x512xf32>
    %139 = arith.addf %137, %138 : vector<4x512xf32>
    %cst_99 = arith.constant 0.000000e+00 : f32
    %140 = vector.broadcast %cst_99 : f32 to vector<4x512xf32>
    %141 = arith.maximumf %139, %140 : vector<4x512xf32>
    %c0_100 = arith.constant 0 : index
    %c0_101 = arith.constant 0 : index
    %142 = vector.load %arg0[%c0_100, %c0_101] : memref<4x512xf32, #tpu.memory_space<vmem>>, vector<4x512xf32>
    %143 = arith.addf %142, %141 : vector<4x512xf32>
    %c0_102 = arith.constant 0 : index
    %c0_103 = arith.constant 0 : index
    %144 = vector.load %arg4[%c0_102, %c0_103] : memref<4x512xf32, #tpu.memory_space<vmem>>, vector<4x512xf32>
    tpu.vector_store %arg4[%c0_102, %c0_103], %143 {strides = array<i32>} : memref<4x512xf32, #tpu.memory_space<vmem>>, vector<4x512xf32>,
    return
  }
}

</mosaic_0001>

<bundles_post_ra>
// kernel: resblock_pallas.1
= control target key start
LH: loop header
LB: loop body
LE: loop exit
PB: predicated region body
PF: predicated region fallthrough
CT: control target
= control target key end

     0   :  { %s1528_s19 = smov 17   ;;  %s1529_s20 = smov 16   ;;  %v45_v40 = vlaneseq  ;;  %vm476_vm8 = vcmask 392192   ;;  %vm1362_vm15 = vcmask 1043456   ;;  %s2447_s0 = inlined_call_operand.vmem [shape: f32[4,512], index: 0, kind: input, shape index: {}]   ;;  %s2448_s3 = inlined_call_operand.vmem [shape: f32[48,512], index: 3, kind: input, shape index: {}]   ;;  %s2449_s1 = inlined_call_operand.vmem [shape: bf16[2,4,48], index: 1, kind: input, shape index: {}]   ;;  %s2450_s2 = inlined_call_operand.vmem [shape: f32[4,4], index: 2, kind: input, shape index: {}]   ;;  %s2451_s4 = inlined_call_operand.vmem [shape: f32[4,512], index: 4, kind: output, shape index: {}]  }
   0x1   :  { %v1572_v0 = vld [vmem:[%s2447_s0 + $0x8] sm:$0xff]  ;;  %v1577_v1 = vld [vmem:[%s2447_s0] sm:$0xff]  ;;  %s1530_s21 = smov 15   ;;  %s1531_s22 = smov 1   ;;  %v55_v42 = vld [vmem:[%s2448_s3 + $0x18] sm:$0xf] }
   0x2   :  { %28 = vst [vmem:[#allocation1 + $0x10] ss:$2 sm:$0xff] %v1572_v0  ;;  %s1532_s23 = smov 127   ;;  %s1533_s24 = smov 113   ;;  %v1650_v41 = vand.u32 127, %v45_v40 }
   0x3   :  { %26 = vst [vmem:[#allocation1] ss:$2 sm:$0xff] %v1577_v1  ;;  %s1534_s25 = smov 112   ;;  %s1535_s26 = smov 111   ;;  %v54_v45 = vld [vmem:[%s2448_s3 + $0x10] sm:$0xf] }
   0x4   :  { %vm47_vm0 = vcmp.lt.s32.totalorder %v1650_v41, 17  ;;  %v91_v52 = vld [vmem:[%s2448_s3 + $0x18] sm:$0xf0]  ;;  %v90_v53 = vld [vmem:[%s2448_s3 + $0x10] sm:$0xf0]  ;;  %vm83_vm1 = vcmp.lt.s32.totalorder %v1650_v41, 16 }
   0x5   :  { %v99_v54 = vrot.slane %v91_v52, 4  ;;  %v98_v55 = vrot.slane %v90_v53, 4  ;;  %vm137_vm2 = vcmp.lt.s32.totalorder %v1650_v41, 15  ;;  %vm173_vm3 = vcmp.lt.s32.totalorder %v1650_v41, 1  ;;  %s1541_s30 = smov 126   ;;  %s1542_s5 = smov 3  }
   0x6   :  { %vm242_vm4 = vcmp.lt.s32.totalorder %v1650_v41, 127  ;;  %vm296_vm5 = vcmp.lt.s32.totalorder %v1650_v41, 113  ;;  %v1536_v52 = vmov 0   ;;  %vm332_vm6 = vcmp.lt.s32.totalorder %v1650_v41, 112 }
   0x7   :  { %19 = vst [vmem:[#allocation2 + $0x48] sm:$0xcc] %v1536_v52  ;;  %1520 = vset.pattern.permute.xlu0 %v1536_v52  ;;  %vm386_vm7 = vcmp.lt.s32.totalorder %v1650_v41, 111 }
   0x8   :  { %21 = vst [vmem:[#allocation2 + $0x58] sm:$0xff] %v1536_v52 }
   0x9   :  { %v31_v2 = vld.sshfl [vmem:[#allocation1 + $0x10] sm:$0xff pattern:$0x75316420]  ;;  %v32_v3 = vld.sshfl [vmem:[#allocation1 + $0x18] sm:$0xff pattern:$0x75316420] }
   0xa   :  { %41 = vrot.lane.b32.xlu1 %v31_v2, %s1528_s19  ;;  %v30_v4 = vld.sshfl [vmem:[#allocation1 + $0x8] sm:$0xff pattern:$0x75316420]  ;;  %v1582_v5 = vld.sshfl [vmem:[#allocation1] sm:$0xff pattern:$0x75316420]  ;;  %43 = vrot.lane.b32.xlu2 %v32_v3, %s1528_s19 }
   0xb   :  { %39 = vrot.lane.b32.xlu0 %v30_v4, %s1528_s19  ;;  %64 = vst [vmem:[#allocation1] ss:$2 sm:$0xff] %v1577_v1  ;;  %v145_v2 = vld [vmem:[%s2448_s3 + $0x38] sm:$0xf]  ;;  %v144_v3 = vld [vmem:[%s2448_s3 + $0x30] sm:$0xf] }
   0xc   :  { %66 = vst [vmem:[#allocation1 + $0x10] ss:$2 sm:$0xff] %v1572_v0 }
   0xd   :  { %18 = vst [vmem:[#allocation2 + $0x40] sm:$0xcc] %v1536_v52 }
   0xe   :  { %20 = vst [vmem:[#allocation2 + $0x50] sm:$0xff] %v1536_v52 }
  0x12   :  { %v68_v6 = vld.sshfl [vmem:[#allocation1 + $0x8] sm:$0xff pattern:$0x75316420]  ;;  %v1588_v7 = vld.sshfl [vmem:[#allocation1] sm:$0xff pattern:$0x75316420] }
  0x13   :  { %v69_v8 = vld.sshfl [vmem:[#allocation1 + $0x10] sm:$0xff pattern:$0x75316420]  ;;  %77 = vrot.lane.b32.xlu0 %v68_v6, %s1529_s20  ;;  %118 = vst [vmem:[#allocation1] ss:$2 sm:$0xff] %v1577_v1 }
  0x14   :  { %79 = vrot.lane.b32.xlu1 %v69_v8, %s1529_s20  ;;  %v70_v9 = vld.sshfl [vmem:[#allocation1 + $0x18] sm:$0xff pattern:$0x75316420] }
  0x15   :  { %81 = vrot.lane.b32.xlu2 %v70_v9, %s1529_s20  ;;  %120 = vst [vmem:[#allocation1 + $0x10] ss:$2 sm:$0xff] %v1572_v0 }
  0x1a   :  { %v122_v10 = vld.sshfl [vmem:[#allocation1 + $0x8] sm:$0xff pattern:$0x75316420]  ;;  %v1595_v11 = vld.sshfl [vmem:[#allocation1] sm:$0xff pattern:$0x75316420] }
  0x1b   :  { %131 = vrot.lane.b32.xlu0 %v122_v10, %s1530_s21  ;;  %154 = vst [vmem:[#allocation1] ss:$2 sm:$0xff] %v1577_v1  ;;  %v181_v10 = vld [vmem:[%s2448_s3 + $0x38] sm:$0xf0] }
  0x1c   :  { %v123_v12 = vld.sshfl [vmem:[#allocation1 + $0x10] sm:$0xff pattern:$0x75316420]  ;;  %v124_v13 = vld.sshfl [vmem:[#allocation1 + $0x18] sm:$0xff pattern:$0x75316420] }
  0x1d   :  { %133 = vrot.lane.b32.xlu1 %v123_v12, %s1530_s21  ;;  %135 = vrot.lane.b32.xlu2 %v124_v13, %s1530_s21  ;;  %156 = vst [vmem:[#allocation1 + $0x10] ss:$2 sm:$0xff] %v1572_v0  ;;  %v189_v13 = vrot.slane %v181_v10, 4 }
  0x22   :  { %v158_v14 = vld.sshfl [vmem:[#allocation1 + $0x8] sm:$0xff pattern:$0x75316420]  ;;  %v157_v15 = vld.sshfl [vmem:[#allocation1] sm:$0xff pattern:$0x75316420] }
  0x23   :  { %167 = vrot.lane.b32.xlu0 %v158_v14, %s1531_s22  ;;  %208 = vst [vmem:[#allocation1] ss:$2 sm:$0xff] %v1577_v1 }
  0x24   :  { %v159_v16 = vld.sshfl [vmem:[#allocation1 + $0x10] sm:$0xff pattern:$0x75316420]  ;;  %v160_v17 = vld.sshfl [vmem:[#allocation1 + $0x18] sm:$0xff pattern:$0x75316420] }
  0x25   :  { %169 = vrot.lane.b32.xlu1 %v159_v16, %s1531_s22  ;;  %171 = vrot.lane.b32.xlu2 %v160_v17, %s1531_s22  ;;  %210 = vst [vmem:[#allocation1 + $0x10] ss:$2 sm:$0xff] %v1572_v0 }
  0x2a   :  { %v1607_v18 = vld.sshfl [vmem:[#allocation1] sm:$0xff pattern:$0x75316420]  ;;  %v1609_v19 = vld.sshfl [vmem:[#allocation1 + $0x8] sm:$0xff pattern:$0x75316420] }
  0x2b   :  { %223 = vst [vmem:[#allocation1] ss:$2 sm:$0xff] %v1577_v1 }
  0x2c   :  { %v1612_v20 = vld.sshfl [vmem:[#allocation1 + $0x10] sm:$0xff pattern:$0x75316420]  ;;  %v1614_v21 = vld.sshfl [vmem:[#allocation1 + $0x18] sm:$0xff pattern:$0x75316420] }
  0x2d   :  { %225 = vst [vmem:[#allocation1 + $0x10] ss:$2 sm:$0xff] %v1572_v0 }
  0x32   :  { %v226_v22 = vld.sshfl [vmem:[#allocation1] sm:$0xff pattern:$0x75316420]  ;;  %v227_v23 = vld.sshfl [vmem:[#allocation1 + $0x8] sm:$0xff pattern:$0x75316420] }
  0x33   :  { %234 = vrot.lane.b32.xlu1 %v226_v22, %s1532_s23  ;;  %277 = vst [vmem:[#allocation1] ss:$2 sm:$0xff] %v1577_v1  ;;  %v220_v22 = vpack.c.bf16 %v1614_v21, %v1612_v20  ;;  %v250_v21 = vld [vmem:[%s2448_s3 + $0x58] sm:$0xf0] }
  0x34   :  { %v228_v24 = vld.sshfl [vmem:[#allocation1 + $0x10] sm:$0xff pattern:$0x75316420]  ;;  %v229_v25 = vld.sshfl [vmem:[#allocation1 + $0x18] sm:$0xff pattern:$0x75316420] }
  0x35   :  { %238 = vrot.lane.b32.xlu2 %v228_v24, %s1532_s23  ;;  %279 = vst [vmem:[#allocation1 + $0x10] ss:$2 sm:$0xff] %v1572_v0 }
  0x36   :  { %222 = vst [vmem:[#allocation2 + $0x28] sm:$0x33] %v220_v22 }
  0x3a   :  { %v280_v26 = vld.sshfl [vmem:[#allocation1] sm:$0xff pattern:$0x75316420]  ;;  %v281_v27 = vld.sshfl [vmem:[#allocation1 + $0x8] sm:$0xff pattern:$0x75316420] }
  0x3b   :  { %288 = vrot.lane.b32.xlu0 %v280_v26, %s1533_s24  ;;  %313 = vst [vmem:[#allocation1] ss:$2 sm:$0xff] %v1577_v1 }
  0x3c   :  { %v282_v28 = vld.sshfl [vmem:[#allocation1 + $0x10] sm:$0xff pattern:$0x75316420]  ;;  %v283_v29 = vld.sshfl [vmem:[#allocation1 + $0x18] sm:$0xff pattern:$0x75316420] }
  0x3d   :  { %240 = vrot.lane.b32.xlu2 %v229_v25, %s1532_s23  ;;  %292 = vrot.lane.b32.xlu1 %v282_v28, %s1533_s24  ;;  %315 = vst [vmem:[#allocation1 + $0x10] ss:$2 sm:$0xff] %v1572_v0 }
  0x42   :  { %v316_v30 = vld.sshfl [vmem:[#allocation1] sm:$0xff pattern:$0x75316420]  ;;  %v317_v31 = vld.sshfl [vmem:[#allocation1 + $0x8] sm:$0xff pattern:$0x75316420] }
  0x43   :  { %324 = vrot.lane.b32.xlu0 %v316_v30, %s1534_s25  ;;  %367 = vst [vmem:[#allocation1] ss:$2 sm:$0xff] %v1577_v1 }
  0x44   :  { %v318_v32 = vld.sshfl [vmem:[#allocation1 + $0x10] sm:$0xff pattern:$0x75316420]  ;;  %v319_v33 = vld.sshfl [vmem:[#allocation1 + $0x18] sm:$0xff pattern:$0x75316420] }
  0x45   :  { %294 = vrot.lane.b32.xlu2 %v283_v29, %s1533_s24  ;;  %328 = vrot.lane.b32.xlu1 %v318_v32, %s1534_s25  ;;  %369 = vst [vmem:[#allocation1 + $0x10] ss:$2 sm:$0xff] %v1572_v0  ;;  %v249_v29 = vld [vmem:[%s2448_s3 + $0x50] sm:$0xf0]  ;;  %v258_v32 = vrot.slane %v250_v21, 4 }
  0x46   :  { %v257_v30 = vrot.slane %v249_v29, 4 }
  0x4a   :  { %v370_v34 = vld.sshfl [vmem:[#allocation1] sm:$0xff pattern:$0x75316420]  ;;  %v371_v37 = vld.sshfl [vmem:[#allocation1 + $0x8] sm:$0xff pattern:$0x75316420] }
  0x4b   :  { %378 = vrot.lane.b32.xlu0 %v370_v34, %s1535_s26 }
  0x4c   :  { %v373_v35 = vld.sshfl [vmem:[#allocation1 + $0x18] sm:$0xff pattern:$0x75316420]  ;;  %v372_v36 = vld.sshfl [vmem:[#allocation1 + $0x10] sm:$0xff pattern:$0x75316420] }
  0x4d   :  { %330 = vrot.lane.b32.xlu2 %v319_v33, %s1534_s25  ;;  %384 = vrot.lane.b32.xlu1 %v373_v35, %s1535_s26 }
  0x53   :  { %382 = vrot.lane.b32.xlu0 %v372_v36, %s1535_s26 }
  0x55   :  { %236 = vrot.lane.b32.xlu1 %v227_v23, %s1532_s23  ;;  %326 = vrot.lane.b32.xlu2 %v317_v31, %s1534_s25 }
  0x5b   :  { %290 = vrot.lane.b32.xlu0 %v281_v27, %s1533_s24 }
  0x5d   :  { %75 = vrot.lane.b32.xlu1 %v1588_v7, %s1529_s20  ;;  %165 = vrot.lane.b32.xlu2 %v157_v15, %s1531_s22 }
  0x63   :  { %380 = vrot.lane.b32.xlu0 %v371_v37, %s1535_s26 }
  0x64   :  { %v1644_v38 = vpop.permute.xlu2 %43 }
  0x65   :  { %129 = vrot.lane.b32.xlu1 %v1595_v11, %s1530_s21  ;;  %v180_v11 = vld [vmem:[%s2448_s3 + $0x30] sm:$0xf0] }
  0x66   :  { %v188_v14 = vrot.slane %v180_v11, 4 }
  0x6b   :  { %37 = vrot.lane.b32.xlu0 %v1582_v5, %s1528_s19 }
  0x6f   :  { %v1648_v39 = vpop.permute.xlu2 %81 }
  0x77   :  { %v1656_v43 = vpop.permute.xlu2 %135 }
  0x7c   :  { %v42_v44 = vpop.permute.xlu1 %41 }
  0x7d   :  { %v48_v46 = vsel %vm47_vm0, %v42_v44, %v1644_v38  ;;  %v1664_v47 = vpop.permute.xlu0 %39 }
  0x7e   :  { %v59_v48 = vmul.f32 %v55_v42, %v48_v46  ;;  %v49_v49 = vsel %vm47_vm0, %v1664_v47, %v42_v44  ;;  %v304_v44 = vld [vmem:[%s2448_s3 + $0x78] sm:$0xf]  ;;  %v303_v46 = vld [vmem:[%s2448_s3 + $0x70] sm:$0xf] }
  0x7f   :  { %v58_v50 = vmul.f32 %v54_v45, %v49_v49  ;;  %v1676_v56 = vpop.permute.xlu2 %171 }
  0x81   :  { %v61_v51 = vpack.c.bf16 %v59_v48, %v58_v50 }
  0x83   :  { %63 = vst [vmem:[#allocation2 + $0x8] sm:$0x33] %v61_v51 }
  0x85   :  { %v1678_v57 = vpop.permute.xlu0 %77 }
  0x86   :  { %v80_v58 = vpop.permute.xlu1 %79 }
  0x87   :  { %v84_v59 = vsel %vm83_vm1, %v80_v58, %v1648_v39  ;;  %v85_v60 = vsel %vm83_vm1, %v1678_v57, %v80_v58  ;;  %v219_v58 = vpack.c.bf16 %v1609_v19, %v1607_v18 }
  0x88   :  { %v107_v61 = vmul.f32 %v99_v54, %v84_v59  ;;  %v106_v62 = vmul.f32 %v98_v55, %v85_v60  ;;  %v337_v54 = vld [vmem:[%s2448_s3 + $0x60] sm:$0xf0]  ;;  %v340_v55 = vld [vmem:[%s2448_s3 + $0x78] sm:$0xf0]  ;;  %v338_v60 = vld [vmem:[%s2448_s3 + $0x68] sm:$0xf0] }
  0x89   :  { %v345_v19 = vrot.slane %v337_v54, 4  ;;  %221 = vst [vmem:[#allocation2 + $0x20] sm:$0x33] %v219_v58  ;;  %v88_v58 = vld [vmem:[%s2448_s3] sm:$0xf0] }
  0x8a   :  { %v109_v63 = vpack.c.bf16 %v107_v61, %v106_v62  ;;  %v339_v61 = vld [vmem:[%s2448_s3 + $0x70] sm:$0xf0]  ;;  %v178_v62 = vld [vmem:[%s2448_s3 + $0x20] sm:$0xf0] }
  0x8c   :  { %v113_v0 = vrot.slane %v109_v63, 6  ;;  %v179_v63 = vld [vmem:[%s2448_s3 + $0x28] sm:$0xf0] }
  0x8d   :  { %v1687_v1 = vpop.permute.xlu0 %131 }
  0x8e   :  { %117 = vst [vmem:[#allocation2 + $0x8] sm:$0xcc] %v113_v0  ;;  %v348_v0 = vrot.slane %v340_v55, 4 }
  0x8f   :  { %v134_v4 = vpop.permute.xlu1 %133  ;;  %v1695_v5 = vpop.permute.xlu2 %238 }
  0x90   :  { %v138_v6 = vsel %vm137_vm2, %v134_v4, %v1656_v43  ;;  %v139_v7 = vsel %vm137_vm2, %v1687_v1, %v134_v4  ;;  %v186_v4 = vrot.slane %v178_v62, 4  ;;  %v96_v62 = vrot.slane %v88_v58, 4 }
  0x91   :  { %v149_v8 = vmul.f32 %v145_v2, %v138_v6  ;;  %v148_v9 = vmul.f32 %v144_v3, %v139_v7  ;;  %v346_v2 = vrot.slane %v338_v60, 4  ;;  %v347_v3 = vrot.slane %v339_v61, 4 }
  0x92   :  { %v187_v6 = vrot.slane %v179_v63, 4  ;;  %v1537_v58 = vmov 1.0  }
  0x93   :  { %v151_v12 = vpack.c.bf16 %v149_v8, %v148_v9 }
  0x95   :  { %153 = vst [vmem:[#allocation2 + $0x18] sm:$0x33] %v151_v12  ;;  %v1710_v15 = vpop.permute.xlu0 %167 }
  0x97   :  { %v170_v16 = vpop.permute.xlu1 %169  ;;  %v241_v17 = vpop.permute.xlu2 %240 }
  0x98   :  { %v174_v23 = vsel %vm173_vm3, %v170_v16, %v1676_v56  ;;  %v175_v24 = vsel %vm173_vm3, %v1710_v15, %v170_v16  ;;  %v243_v31 = vsel %vm242_vm4, %v1695_v5, %v241_v17 }
  0x99   :  { %v197_v25 = vmul.f32 %v189_v13, %v174_v23  ;;  %v196_v26 = vmul.f32 %v188_v14, %v175_v24  ;;  %v265_v33 = vmul.f32 %v257_v30, %v243_v31 }
  0x9b   :  { %v199_v27 = vpack.c.bf16 %v197_v25, %v196_v26 }
  0x9d   :  { %v203_v28 = vrot.slane %v199_v27, 6 }
  0x9f   :  { %207 = vst [vmem:[#allocation2 + $0x18] sm:$0xcc] %v203_v28  ;;  %v295_v20 = vpop.permute.xlu2 %294 }
  0xa5   :  { %v1730_v34 = vpop.permute.xlu1 %234 }
  0xa6   :  { %v246_v35 = vsel %vm242_vm4, %v241_v17, %v1730_v34 }
  0xa7   :  { %v331_v36 = vpop.permute.xlu2 %330  ;;  %v266_v37 = vmul.f32 %v258_v32, %v246_v35 }
  0xa9   :  { %v268_v40 = vpack.c.bf16 %v266_v37, %v265_v33  ;;  %v394_v33 = vld [vmem:[%s2448_s3 + $0x98] sm:$0xf] }
  0xab   :  { %v272_v42 = vrot.slane %v268_v40, 6 }
  0xad   :  { %276 = vst [vmem:[#allocation2 + $0x28] sm:$0xcc] %v272_v42  ;;  %v1739_v45 = vpop.permute.xlu0 %288 }
  0xae   :  { %v300_v48 = vsel %vm296_vm5, %v295_v20, %v1739_v45 }
  0xaf   :  { %v1747_v49 = vpop.permute.xlu1 %292  ;;  %v308_v50 = vmul.f32 %v304_v44, %v300_v48  ;;  %v327_v51 = vpop.permute.xlu2 %326 }
  0xb0   :  { %v297_v53 = vsel %vm296_vm5, %v1747_v49, %v295_v20 }
  0xb1   :  { %v307_v59 = vmul.f32 %v303_v46, %v297_v53 }
  0xb3   :  { %v310_v18 = vpack.c.bf16 %v308_v50, %v307_v59  ;;  %v89_v59 = vld [vmem:[%s2448_s3 + $0x8] sm:$0xf0] }
  0xb4   :  { %v97_v63 = vrot.slane %v89_v59, 4 }
  0xb5   :  { %312 = vst [vmem:[#allocation2 + $0x38] sm:$0x33] %v310_v18  ;;  %v325_v7 = vpop.permute.xlu0 %324 }
  0xb6   :  { %v335_v8 = vsel %vm332_vm6, %v325_v7, %v327_v51  ;;  %v336_v9 = vsel %vm332_vm6, %v331_v36, %v325_v7 }
  0xb7   :  { %v329_v10 = vpop.permute.xlu1 %328  ;;  %v166_v11 = vpop.permute.xlu2 %165  ;;  %v353_v12 = vmul.f32 %v345_v19, %v335_v8  ;;  %v356_v13 = vmul.f32 %v348_v0, %v336_v9  ;;  %v1491_v8 = vld [vmem:[#allocation2 + $0x54] sm:$0xf0]  ;;  %v1419_v9 = vld [vmem:[#allocation2 + $0x58] sm:$0xf0] }
  0xb8   :  { %v333_v14 = vsel %vm332_vm6, %v329_v10, %v331_v36  ;;  %v334_v16 = vsel %vm332_vm6, %v327_v51, %v329_v10  ;;  %v176_v17 = vsel %vm173_vm3, %v166_v11, %v1710_v15  ;;  %v177_v22 = vsel %vm173_vm3, %v1676_v56, %v166_v11  ;;  %v247_v56 = vld [vmem:[%s2448_s3 + $0x40] sm:$0xf0]  ;;  %v248_v15 = vld [vmem:[%s2448_s3 + $0x48] sm:$0xf0]  ;;  %v393_v36 = vld [vmem:[%s2448_s3 + $0x90] sm:$0xf] }
  0xb9   :  { %v354_v23 = vmul.f32 %v346_v2, %v334_v16  ;;  %v355_v24 = vmul.f32 %v347_v3, %v333_v14  ;;  %v194_v25 = vmul.f32 %v186_v4, %v177_v22  ;;  %v195_v26 = vmul.f32 %v187_v6, %v176_v17  ;;  %v391_v17 = vld [vmem:[%s2448_s3 + $0x80] sm:$0xf] }
  0xba   :  { %v255_v37 = vrot.slane %v247_v56, 4  ;;  %v256_v40 = vrot.slane %v248_v15, 4 }
  0xbb   :  { %v198_v27 = vpack.c.bf16 %v195_v26, %v194_v25  ;;  %v357_v28 = vpack.c.bf16 %v354_v23, %v353_v12  ;;  %v358_v29 = vpack.c.bf16 %v356_v13, %v355_v24  ;;  %v1401_v25 = vld [vmem:[#allocation2 + $0x28] sm:$0xf]  ;;  %v142_v26 = vld [vmem:[%s2448_s3 + $0x20] sm:$0xf] }
  0xbd   :  { %v202_v20 = vrot.slane %v198_v27, 6  ;;  %v361_v21 = vrot.slane %v357_v28, 6  ;;  %v362_v30 = vrot.slane %v358_v29, 6  ;;  %v1787_v31 = vpop.permute.xlu0 %378  ;;  %v143_v27 = vld [vmem:[%s2448_s3 + $0x28] sm:$0xf] }
  0xbf   :  { %206 = vst [vmem:[#allocation2 + $0x10] sm:$0xcc] %v202_v20  ;;  %v385_v32 = vpop.permute.xlu1 %384  ;;  %v1485_v20 = vld [vmem:[#allocation2 + $0x2c] sm:$0xf] }
  0xc0   :  { %365 = vst [vmem:[#allocation2 + $0x30] sm:$0xcc] %v361_v21  ;;  %v390_v35 = vsel %vm386_vm7, %v385_v32, %v1787_v31 }
  0xc1   :  { %366 = vst [vmem:[#allocation2 + $0x38] sm:$0xcc] %v362_v30  ;;  %v398_v46 = vmul.f32 %v394_v33, %v390_v35 }
  0xc5   :  { %v383_v42 = vpop.permute.xlu0 %382 }
  0xc6   :  { %v387_v44 = vsel %vm386_vm7, %v383_v42, %v385_v32 }
  0xc7   :  { %v237_v48 = vpop.permute.xlu1 %236  ;;  %v397_v50 = vmul.f32 %v393_v36, %v387_v44  ;;  %v1483_v36 = vld [vmem:[#allocation2 + $0x14] sm:$0xf0]  ;;  %v1385_v44 = vld [vmem:[#allocation2 + $0x8] sm:$0xf] }
  0xc8   :  { %v244_v51 = vsel %vm242_vm4, %v237_v48, %v1695_v5  ;;  %v245_v52 = vsel %vm242_vm4, %v1730_v34, %v237_v48  ;;  %v301_v5 = vld [vmem:[%s2448_s3 + $0x60] sm:$0xf]  ;;  %v302_v34 = vld [vmem:[%s2448_s3 + $0x68] sm:$0xf]  ;;  %v1403_v22 = vld [vmem:[#allocation2 + $0x38] sm:$0xf0] }
  0xc9   :  { %v263_v53 = vmul.f32 %v255_v37, %v245_v52  ;;  %v264_v54 = vmul.f32 %v256_v40, %v244_v51  ;;  %v400_v55 = vpack.c.bf16 %v398_v46, %v397_v50  ;;  %v1406_v15 = vor.u32 %v1485_v20, %v1403_v22  ;;  %v1387_v37 = vld [vmem:[#allocation2 + $0x18] sm:$0xf0]  ;;  %v1481_v46 = vld [vmem:[#allocation2 + $0xc] sm:$0xf] }
  0xca   :  { %v1386_v50 = vor.u32 %v1483_v36, %v1385_v44  ;;  %v1390_v51 = vor.u32 %v1481_v46, %v1387_v37 }
  0xcb   :  { %v267_v60 = vpack.c.bf16 %v264_v54, %v263_v53  ;;  %402 = vst [vmem:[#allocation2 + $0x48] sm:$0x33] %v400_v55  ;;  %v403_v53 = vld [vmem:[%s2449_s1] sm:$0x3] }
  0xcd   :  { %v271_v61 = vrot.slane %v267_v60, 6  ;;  %v291_v18 = vpop.permute.xlu0 %290 }
  0xce   :  { %v298_v19 = vsel %vm296_vm5, %v291_v18, %v1747_v49  ;;  %v299_v0 = vsel %vm296_vm5, %v1739_v45, %v291_v18 }
  0xcf   :  { %275 = vst [vmem:[#allocation2 + $0x20] sm:$0xcc] %v271_v61  ;;  %v76_v2 = vpop.permute.xlu1 %75  ;;  %v305_v3 = vmul.f32 %v301_v5, %v299_v0  ;;  %v306_v4 = vmul.f32 %v302_v34, %v298_v19  ;;  %v1490_v5 = vld [vmem:[#allocation2 + $0x4c] sm:$0xf0]  ;;  %v1411_v34 = vld [vmem:[#allocation2 + $0x50] sm:$0xf0] }
  0xd0   :  { %v86_v6 = vsel %vm83_vm1, %v76_v2, %v1678_v57  ;;  %v87_v7 = vsel %vm83_vm1, %v1648_v39, %v76_v2  ;;  %v392_v57 = vld [vmem:[%s2448_s3 + $0x88] sm:$0xf]  ;;  %v1487_v39 = vld [vmem:[#allocation2 + $0x34] sm:$0xf0] }
  0xd1   :  { %v104_v10 = vmul.f32 %v96_v62, %v87_v7  ;;  %v105_v49 = vmul.f32 %v97_v63, %v86_v6  ;;  %v309_v11 = vpack.c.bf16 %v306_v4, %v305_v3  ;;  %v1402_v56 = vor.u32 %v1487_v39, %v1401_v25 }
  0xd2   :  { %v1417_v12 = vld [vmem:[#allocation2 + $0x48] sm:$0xf]  ;;  %v1489_v13 = vld [vmem:[#allocation2 + $0x4c] sm:$0xf] }
  0xd3   :  { %v108_v45 = vpack.c.bf16 %v105_v49, %v104_v10  ;;  %311 = vst [vmem:[#allocation2 + $0x30] sm:$0x33] %v309_v11  ;;  %v1418_v14 = vor.u32 %v1491_v8, %v1417_v12  ;;  %v1422_v16 = vor.u32 %v1489_v13, %v1419_v9 }
  0xd5   :  { %v112_v23 = vrot.slane %v108_v45, 6  ;;  %511 = vmatpush.bf16.msra.mxu2 %v1418_v14  ;;  %524 = vmatpush.bf16.msra.mxu3 %v1422_v16  ;;  %v381_v24 = vpop.permute.xlu0 %380 }
  0xd6   :  { %v388_v28 = vsel %vm386_vm7, %v381_v24, %v383_v42  ;;  %v389_v29 = vsel %vm386_vm7, %v1787_v31, %v381_v24  ;;  %v1393_v0 = vld [vmem:[#allocation2 + $0x20] sm:$0xf]  ;;  %v1484_v2 = vld [vmem:[#allocation2 + $0x24] sm:$0xf] }
  0xd7   :  { %116 = vst [vmem:[#allocation2] sm:$0xcc] %v112_v23  ;;  %v130_v21 = vpop.permute.xlu1 %129  ;;  %v395_v30 = vmul.f32 %v391_v17, %v389_v29  ;;  %v396_v32 = vmul.f32 %v392_v57, %v388_v28 }
  0xd8   :  { %v140_v33 = vsel %vm137_vm2, %v130_v21, %v1687_v1  ;;  %v141_v35 = vsel %vm137_vm2, %v1656_v43, %v130_v21  ;;  %v52_v1 = vld [vmem:[%s2448_s3] sm:$0xf]  ;;  %v53_v43 = vld [vmem:[%s2448_s3 + $0x8] sm:$0xf] }
  0xd9   :  { %v146_v40 = vmul.f32 %v142_v26, %v141_v35  ;;  %v147_v42 = vmul.f32 %v143_v27, %v140_v33  ;;  %v399_v31 = vpack.c.bf16 %v396_v32, %v395_v30  ;;  %512 = vmatpush.bf16.msra.mxu2 %v1402_v56  ;;  %525 = vmatpush.bf16.msra.mxu3 %v1406_v15 }
  0xda   :  { %v1486_v18 = vld [vmem:[#allocation2 + $0x2c] sm:$0xf0]  ;;  %v1395_v19 = vld [vmem:[#allocation2 + $0x30] sm:$0xf0] }
  0xdb   :  { %v150_v48 = vpack.c.bf16 %v147_v42, %v146_v40  ;;  %401 = vst [vmem:[#allocation2 + $0x40] sm:$0x33] %v399_v31  ;;  %v1394_v3 = vor.u32 %v1486_v18, %v1393_v0  ;;  %v1398_v4 = vor.u32 %v1484_v2, %v1395_v19 }
  0xdd   :  { %152 = vst [vmem:[#allocation2 + $0x10] sm:$0x33] %v150_v48  ;;  %513 = vmatpush.bf16.msra.mxu2 %v1386_v50  ;;  %526 = vmatpush.bf16.msra.mxu3 %v1390_v51  ;;  %v38_v52 = vpop.permute.xlu0 %37 }
  0xde   :  { %v50_v54 = vsel %vm47_vm0, %v38_v52, %v1664_v47  ;;  %v51_v55 = vsel %vm47_vm0, %v1644_v38, %v38_v52 }
  0xdf   :  { %v56_v59 = vmul.f32 %v52_v1, %v51_v55  ;;  %v57_v60 = vmul.f32 %v53_v43, %v50_v54  ;;  %v700_v43 = vld [vmem:[%s2450_s2] sm:$0xf] }
  0xe0   :  { %1425 = vmatmul.msk.bf16.vlgmr.msra.gmra.mxu2 %vm476_vm8, %v403_v53  ;;  %1426 = vmatmul.msk.bf16.vlgmr.msra.gmra.mxu3 %vm476_vm8, %v403_v53 }
  0xe1   :  { %572 = vmatpush.msrb.mxu2 %v1537_v58  ;;  %592 = vmatpush.msrb.mxu3 %v1537_v58  ;;  %v60_v61 = vpack.c.bf16 %v57_v60, %v56_v59  ;;  %v1538_v59 = vmov 1  }
  0xe2   :  { %v1409_v47 = vld [vmem:[#allocation2 + $0x40] sm:$0xf]  ;;  %v1488_v38 = vld [vmem:[#allocation2 + $0x44] sm:$0xf]  ;;  %1521 = vset.pattern.permute.xlu1 %v1538_v59 }
  0xe3   :  { %573 = vmatpush.msrb.mxu2 %v1537_v58  ;;  %593 = vmatpush.msrb.mxu3 %v1537_v58  ;;  %62 = vst [vmem:[#allocation2] sm:$0x33] %v60_v61  ;;  %v1410_v62 = vor.u32 %v1490_v5, %v1409_v47  ;;  %v1414_v63 = vor.u32 %v1488_v38, %v1411_v34 }
  0xe4   :  { %v1482_v6 = vld [vmem:[#allocation2 + $0xc] sm:$0xf0]  ;;  %v1379_v9 = vld [vmem:[#allocation2 + $0x10] sm:$0xf0] }
  0xe5   :  { %574 = vmatpush.msrb.mxu2 %v1537_v58  ;;  %594 = vmatpush.msrb.mxu3 %v1537_v58 }
  0xe6   :  { %485 = vmatpush.bf16.msra.mxu0 %v1410_v62  ;;  %498 = vmatpush.bf16.msra.mxu1 %v1414_v63 }
  0xe7   :  { %575 = vmatpush.msrb.mxu2 %v1537_v58  ;;  %595 = vmatpush.msrb.mxu3 %v1537_v58 }
  0xe9   :  { %576 = vmatpush.msrb.mxu2 %v1537_v58  ;;  %596 = vmatpush.msrb.mxu3 %v1537_v58 }
  0xea   :  { %486 = vmatpush.bf16.msra.mxu0 %v1394_v3  ;;  %499 = vmatpush.bf16.msra.mxu1 %v1398_v4  ;;  %v1377_v7 = vld [vmem:[#allocation2] sm:$0xf]  ;;  %v1480_v8 = vld [vmem:[#allocation2 + $0x4] sm:$0xf] }
  0xeb   :  { %577 = vmatpush.msrb.mxu2 %v1537_v58  ;;  %597 = vmatpush.msrb.mxu3 %v1537_v58  ;;  %v1378_v10 = vor.u32 %v1482_v6, %v1377_v7  ;;  %v1382_v49 = vor.u32 %v1480_v8, %v1379_v9 }
  0xed   :  { %578 = vmatpush.msrb.mxu2 %v1537_v58  ;;  %598 = vmatpush.msrb.mxu3 %v1537_v58 }
  0xee   :  { %487 = vmatpush.bf16.msra.mxu0 %v1378_v10  ;;  %500 = vmatpush.bf16.msra.mxu1 %v1382_v49 }
  0xef   :  { %579 = vmatpush.msrb.mxu2 %v1537_v58  ;;  %599 = vmatpush.msrb.mxu3 %v1537_v58 }
  0xf1   :  { %1423 = vmatmul.msk.bf16.vlgmr.msra.gmra.mxu0 %vm476_vm8, %v403_v53  ;;  %1424 = vmatmul.msk.bf16.vlgmr.msra.gmra.mxu1 %vm476_vm8, %v403_v53 }
  0xf2   :  { %532 = vmatpush.msrb.mxu0 %v1537_v58  ;;  %552 = vmatpush.msrb.mxu1 %v1537_v58 }
  0xf3   :  { %580 = vmatpush.msrb.mxu2 %v1537_v58  ;;  %600 = vmatpush.msrb.mxu3 %v1537_v58 }
  0xf4   :  { %533 = vmatpush.msrb.mxu0 %v1537_v58  ;;  %553 = vmatpush.msrb.mxu1 %v1537_v58 }
  0xf5   :  { %581 = vmatpush.msrb.mxu2 %v1537_v58  ;;  %601 = vmatpush.msrb.mxu3 %v1537_v58 }
  0xf6   :  { %534 = vmatpush.msrb.mxu0 %v1537_v58  ;;  %554 = vmatpush.msrb.mxu1 %v1537_v58 }
  0xf7   :  { %582 = vmatpush.msrb.mxu2 %v1537_v58  ;;  %602 = vmatpush.msrb.mxu3 %v1537_v58 }
  0xf8   :  { %535 = vmatpush.msrb.mxu0 %v1537_v58  ;;  %555 = vmatpush.msrb.mxu1 %v1537_v58 }
  0xf9   :  { %583 = vmatpush.msrb.mxu2 %v1537_v58  ;;  %603 = vmatpush.msrb.mxu3 %v1537_v58 }
  0xfa   :  { %536 = vmatpush.msrb.mxu0 %v1537_v58  ;;  %556 = vmatpush.msrb.mxu1 %v1537_v58 }
  0xfb   :  { %584 = vmatpush.msrb.mxu2 %v1537_v58  ;;  %604 = vmatpush.msrb.mxu3 %v1537_v58 }
  0xfc   :  { %537 = vmatpush.msrb.mxu0 %v1537_v58  ;;  %557 = vmatpush.msrb.mxu1 %v1537_v58 }
  0xfd   :  { %585 = vmatpush.msrb.mxu2 %v1537_v58  ;;  %605 = vmatpush.msrb.mxu3 %v1537_v58 }
  0xfe   :  { %538 = vmatpush.msrb.mxu0 %v1537_v58  ;;  %558 = vmatpush.msrb.mxu1 %v1537_v58 }
  0xff   :  { %586 = vmatpush.msrb.mxu2 %v1537_v58  ;;  %606 = vmatpush.msrb.mxu3 %v1537_v58 }
 0x100   :  { %539 = vmatpush.msrb.mxu0 %v1537_v58  ;;  %559 = vmatpush.msrb.mxu1 %v1537_v58 }
 0x101   :  { %587 = vmatpush.msrb.mxu2 %v1537_v58  ;;  %607 = vmatpush.msrb.mxu3 %v1537_v58 }
 0x102   :  { %540 = vmatpush.msrb.mxu0 %v1537_v58  ;;  %560 = vmatpush.msrb.mxu1 %v1537_v58 }
 0x103   :  { %657 = vmatpush.msra.mxu2 %v1537_v58  ;;  %677 = vmatpush.msra.mxu3 %v1537_v58 }
 0x104   :  { %541 = vmatpush.msrb.mxu0 %v1537_v58  ;;  %561 = vmatpush.msrb.mxu1 %v1537_v58 }
 0x105   :  { %658 = vmatpush.msra.mxu2 %v1537_v58  ;;  %678 = vmatpush.msra.mxu3 %v1537_v58 }
 0x106   :  { %542 = vmatpush.msrb.mxu0 %v1537_v58  ;;  %562 = vmatpush.msrb.mxu1 %v1537_v58 }
 0x107   :  { %659 = vmatpush.msra.mxu2 %v1537_v58  ;;  %679 = vmatpush.msra.mxu3 %v1537_v58 }
 0x108   :  { %543 = vmatpush.msrb.mxu0 %v1537_v58  ;;  %563 = vmatpush.msrb.mxu1 %v1537_v58 }
 0x109   :  { %660 = vmatpush.msra.mxu2 %v1537_v58  ;;  %680 = vmatpush.msra.mxu3 %v1537_v58 }
 0x10a   :  { %544 = vmatpush.msrb.mxu0 %v1537_v58  ;;  %564 = vmatpush.msrb.mxu1 %v1537_v58 }
 0x10b   :  { %661 = vmatpush.msra.mxu2 %v1537_v58  ;;  %681 = vmatpush.msra.mxu3 %v1537_v58 }
 0x10c   :  { %545 = vmatpush.msrb.mxu0 %v1537_v58  ;;  %565 = vmatpush.msrb.mxu1 %v1537_v58 }
 0x10d   :  { %662 = vmatpush.msra.mxu2 %v1537_v58  ;;  %682 = vmatpush.msra.mxu3 %v1537_v58 }
 0x10e   :  { %546 = vmatpush.msrb.mxu0 %v1537_v58  ;;  %566 = vmatpush.msrb.mxu1 %v1537_v58 }
 0x10f   :  { %663 = vmatpush.msra.mxu2 %v1537_v58  ;;  %683 = vmatpush.msra.mxu3 %v1537_v58 }
 0x110   :  { %547 = vmatpush.msrb.mxu0 %v1537_v58  ;;  %567 = vmatpush.msrb.mxu1 %v1537_v58 }
 0x111   :  { %664 = vmatpush.msra.mxu2 %v1537_v58  ;;  %684 = vmatpush.msra.mxu3 %v1537_v58 }
 0x112   :  { %617 = vmatpush.msra.mxu0 %v1537_v58  ;;  %637 = vmatpush.msra.mxu1 %v1537_v58 }
 0x113   :  { %665 = vmatpush.msra.mxu2 %v1537_v58  ;;  %685 = vmatpush.msra.mxu3 %v1537_v58 }
 0x114   :  { %618 = vmatpush.msra.mxu0 %v1537_v58  ;;  %638 = vmatpush.msra.mxu1 %v1537_v58 }
 0x115   :  { %666 = vmatpush.msra.mxu2 %v1537_v58  ;;  %686 = vmatpush.msra.mxu3 %v1537_v58 }
 0x116   :  { %619 = vmatpush.msra.mxu0 %v1537_v58  ;;  %639 = vmatpush.msra.mxu1 %v1537_v58 }
 0x117   :  { %667 = vmatpush.msra.mxu2 %v1537_v58  ;;  %687 = vmatpush.msra.mxu3 %v1537_v58 }
 0x118   :  { %620 = vmatpush.msra.mxu0 %v1537_v58  ;;  %640 = vmatpush.msra.mxu1 %v1537_v58 }
 0x119   :  { %668 = vmatpush.msra.mxu2 %v1537_v58  ;;  %688 = vmatpush.msra.mxu3 %v1537_v58 }
 0x11a   :  { %621 = vmatpush.msra.mxu0 %v1537_v58  ;;  %641 = vmatpush.msra.mxu1 %v1537_v58 }
 0x11b   :  { %669 = vmatpush.msra.mxu2 %v1537_v58  ;;  %689 = vmatpush.msra.mxu3 %v1537_v58 }
 0x11c   :  { %622 = vmatpush.msra.mxu0 %v1537_v58  ;;  %642 = vmatpush.msra.mxu1 %v1537_v58 }
 0x11d   :  { %670 = vmatpush.msra.mxu2 %v1537_v58  ;;  %690 = vmatpush.msra.mxu3 %v1537_v58 }
 0x11e   :  { %623 = vmatpush.msra.mxu0 %v1537_v58  ;;  %643 = vmatpush.msra.mxu1 %v1537_v58 }
 0x11f   :  { %671 = vmatpush.msra.mxu2 %v1537_v58  ;;  %691 = vmatpush.msra.mxu3 %v1537_v58 }
 0x120   :  { %624 = vmatpush.msra.mxu0 %v1537_v58  ;;  %644 = vmatpush.msra.mxu1 %v1537_v58 }
 0x121   :  { %672 = vmatpush.msra.mxu2 %v1537_v58  ;;  %692 = vmatpush.msra.mxu3 %v1537_v58 }
 0x122   :  { %625 = vmatpush.msra.mxu0 %v1537_v58  ;;  %645 = vmatpush.msra.mxu1 %v1537_v58 }
 0x124   :  { %626 = vmatpush.msra.mxu0 %v1537_v58  ;;  %646 = vmatpush.msra.mxu1 %v1537_v58 }
 0x126   :  { %627 = vmatpush.msra.mxu0 %v1537_v58  ;;  %647 = vmatpush.msra.mxu1 %v1537_v58 }
 0x128   :  { %628 = vmatpush.msra.mxu0 %v1537_v58  ;;  %648 = vmatpush.msra.mxu1 %v1537_v58 }
 0x12a   :  { %629 = vmatpush.msra.mxu0 %v1537_v58  ;;  %649 = vmatpush.msra.mxu1 %v1537_v58 }
 0x12c   :  { %630 = vmatpush.msra.mxu0 %v1537_v58  ;;  %650 = vmatpush.msra.mxu1 %v1537_v58 }
 0x12e   :  { %631 = vmatpush.msra.mxu0 %v1537_v58  ;;  %651 = vmatpush.msra.mxu1 %v1537_v58 }
 0x130   :  { %632 = vmatpush.msra.mxu0 %v1537_v58  ;;  %652 = vmatpush.msra.mxu1 %v1537_v58 }
 0x163   :  { %v2007_v11 = vpop.f32.mrf.mxu2  ;;  %v2009_v12 = vpop.f32.mrf.mxu3 }
 0x164   :  { %588 = vmatmul.f32.vlgmr.msrb.gmra.mxu2 %v2007_v11  ;;  %608 = vmatmul.f32.vlgmr.msrb.gmra.mxu3 %v2009_v12  ;;  %v615_v13 = vmul.f32 %v2007_v11, %v2007_v11  ;;  %v616_v45 = vmul.f32 %v2009_v12, %v2009_v12 }
 0x16b   :  { %v517_v14 = vpop.f32.mrf.mxu2  ;;  %v530_v16 = vpop.f32.mrf.mxu3 }
 0x16c   :  { %673 = vmatmul.f32.vlgmr.msra.gmra.mxu2 %v615_v13  ;;  %693 = vmatmul.f32.vlgmr.msra.gmra.mxu3 %v616_v45  ;;  %v999_v45 = vld [vmem:[%s2448_s3 + $0x90] sm:$0xf] }
 0x16e   :  { %v489_v17 = vpop.f32.mrf.mxu0  ;;  %v502_v57 = vpop.f32.mrf.mxu1 }
 0x16f   :  { %548 = vmatmul.f32.vlgmr.msrb.gmra.mxu0 %v489_v17  ;;  %568 = vmatmul.f32.vlgmr.msrb.gmra.mxu1 %v502_v57  ;;  %v613_v39 = vmul.f32 %v489_v17, %v489_v17  ;;  %v614_v22 = vmul.f32 %v502_v57, %v502_v57 }
 0x176   :  { %v491_v23 = vpop.f32.mrf.mxu0  ;;  %v504_v24 = vpop.f32.mrf.mxu1 }
 0x177   :  { %633 = vmatmul.f32.vlgmr.msra.gmra.mxu0 %v613_v39  ;;  %653 = vmatmul.f32.vlgmr.msra.gmra.mxu1 %v614_v22  ;;  %v892_v23 = vld [vmem:[%s2448_s3 + $0x58] sm:$0xf0]  ;;  %v891_v24 = vld [vmem:[%s2448_s3 + $0x50] sm:$0xf0] }
 0x1e7   :  { %v589_v25 = vpop.f32.mrf.mxu2  ;;  %v609_v29 = vpop.f32.mrf.mxu3 }
 0x1ec   :  { %v549_v26 = vpop.f32.mrf.mxu0  ;;  %v569_v27 = vpop.f32.mrf.mxu1 }
 0x1ed   :  { %v570_v28 = vadd.f32 %v569_v27, %v549_v26  ;;  %v900_v26 = vrot.slane %v892_v23, 4  ;;  %v899_v27 = vrot.slane %v891_v24, 4 }
 0x1ef   :  { %v590_v20 = vadd.f32 %v589_v25, %v570_v28  ;;  %v674_v15 = vpop.f32.mrf.mxu2  ;;  %v694_v36 = vpop.f32.mrf.mxu3 }
 0x1f1   :  { %v610_v21 = vadd.f32 %v609_v29, %v590_v20 }
 0x1f3   :  { %v612_v33 = vmul.f32 0.001953125, %v610_v21 }
 0x1f4   :  { %v634_v30 = vpop.f32.mrf.mxu0  ;;  %v654_v32 = vpop.f32.mrf.mxu1 }
 0x1f5   :  { %v655_v56 = vadd.f32 %v654_v32, %v634_v30  ;;  %v698_v40 = vmul.f32 %v612_v33, %v612_v33 }
 0x1f7   :  { %v675_v35 = vadd.f32 %v674_v15, %v655_v56  ;;  %v958_v15 = vld [vmem:[%s2448_s3 + $0x78] sm:$0xf0] }
 0x1f9   :  { %v695_v37 = vadd.f32 %v694_v36, %v675_v35  ;;  %v1503_v35 = vld [vmem:[#allocation2 + $0x54] sm:$0xf0]  ;;  %v1472_v36 = vld [vmem:[#allocation2 + $0x58] sm:$0xf0] }
 0x1fb   :  { %v697_v42 = vmul.f32 0.001953125, %v695_v37 }
 0x1fd   :  { %v699_v31 = vsub.f32 %v697_v42, %v698_v40  ;;  %v966_v40 = vrot.slane %v958_v15, 4 }
 0x1ff   :  { %v701_v44 = vadd.f32 1e-05, %v699_v31 }
 0x201   :  { %1524 = vrsqrt.f32 %v701_v44  ;;  %vm708_vm10 = vweird.f32 %v701_v44 }
 0x207   :  { %v1525_v46 = vpop.eup %1524 }
 0x208   :  { %v703_v48 = vmul.f32 %v1525_v46, %v701_v44  ;;  %vm709_vm9 = vweird.f32 %v1525_v46 }
 0x209   :  { %vm710_vm11 = vmor %vm708_vm10, %vm709_vm9 }
 0x20a   :  { %v704_v50 = vmul.f32 %v1525_v46, %v703_v48 }
 0x20c   :  { %v705_v51 = vmul.f32 0.5, %v704_v50 }
 0x20e   :  { %v706_v1 = vsub.f32 1.5, %v705_v51 }
 0x210   :  { %v707_v52 = vmul.f32 %v1525_v46, %v706_v1 }
 0x212   :  { %v711_v53 = vsel %vm710_vm11, %v1525_v46, %v707_v52 }
 0x213   :  { %v712_v54 = vmul.f32 %v711_v53, %v700_v43 }
 0x215   :  { %721 = vperm.xlu0 %1520, %v712_v54   ;;  %v713_v55 = vmul.f32 %v712_v54, %v612_v33  ;;  %v957_v33 = vld [vmem:[%s2448_s3 + $0x70] sm:$0xf0] }
 0x216   :  { %v965_v46 = vrot.slane %v957_v33, 4 }
 0x217   :  { %715 = vrot.lane.b32.xlu2 %v713_v55, %s1531_s22 }
 0x271   :  { %v716_v60 = vpop.permute.xlu2 %715 }
 0x272   :  { %v718_v5 = vsub.f32 %v700_v43, %v716_v60 }
 0x274   :  { %730 = vperm.xlu1 %1521, %v718_v5   ;;  %v934_v5 = vld [vmem:[%s2448_s3 + $0x78] sm:$0xf] }
 0x287   :  { %v722_v34 = vpop.permute.xlu0 %721 }
 0x288   :  { %v724_v61 = vmul.f32 %v722_v34, %v489_v17  ;;  %v725_v47 = vmul.f32 %v722_v34, %v502_v57  ;;  %v726_v38 = vmul.f32 %v722_v34, %v2007_v11  ;;  %v727_v62 = vmul.f32 %v722_v34, %v2009_v12  ;;  %v1000_v12 = vld [vmem:[%s2448_s3 + $0x98] sm:$0xf] }
 0x2e6   :  { %v731_v63 = vpop.permute.xlu1 %730 }
 0x2e7   :  { %v733_v18 = vadd.f32 %v731_v63, %v724_v61  ;;  %v734_v19 = vadd.f32 %v731_v63, %v725_v47  ;;  %v735_v0 = vadd.f32 %v731_v63, %v726_v38  ;;  %v736_v2 = vadd.f32 %v731_v63, %v727_v62  ;;  %v933_v61 = vld [vmem:[%s2448_s3 + $0x70] sm:$0xf] }
 0x2e9   :  { %v737_v3 = vmax.f32 %v733_v18, 0.0  ;;  %v738_v4 = vmax.f32 %v734_v19, 0.0  ;;  %v739_v6 = vmax.f32 %v735_v0, 0.0  ;;  %v740_v7 = vmax.f32 %v736_v2, 0.0  ;;  %v779_v0 = vld [vmem:[%s2448_s3 + $0x10] sm:$0xf0] }
 0x2ea   :  { %v780_v2 = vld [vmem:[%s2448_s3 + $0x18] sm:$0xf0] }
 0x2eb   :  { %989 = vrot.lane.b32.xlu1 %v739_v6, %s1535_s26  ;;  %877 = vrot.lane.b32.xlu0 %v737_v3, %s1532_s23  ;;  %v874_v8 = vpack.c.bf16 %v740_v7, %v739_v6  ;;  %v873_v9 = vpack.c.bf16 %v738_v4, %v737_v3 }
 0x2ec   :  { %985 = vrot.lane.b32.xlu2 %v737_v3, %s1535_s26 }
 0x2ed   :  { %876 = vst [vmem:[#allocation2 + $0x28] sm:$0x33] %v874_v8 }
 0x2ee   :  { %875 = vst [vmem:[#allocation2 + $0x20] sm:$0x33] %v873_v9 }
 0x2f3   :  { %881 = vrot.lane.b32.xlu1 %v739_v6, %s1532_s23  ;;  %943 = vrot.lane.b32.xlu0 %v737_v3, %s1534_s25 }
 0x2f4   :  { %991 = vrot.lane.b32.xlu2 %v740_v7, %s1535_s26 }
 0x2fb   :  { %947 = vrot.lane.b32.xlu1 %v739_v6, %s1534_s25  ;;  %919 = vrot.lane.b32.xlu0 %v737_v3, %s1533_s24 }
 0x2fc   :  { %883 = vrot.lane.b32.xlu2 %v740_v7, %s1532_s23 }
 0x303   :  { %923 = vrot.lane.b32.xlu1 %v739_v6, %s1533_s24  ;;  %767 = vrot.lane.b32.xlu0 %v738_v4, %s1529_s20 }
 0x304   :  { %949 = vrot.lane.b32.xlu2 %v740_v7, %s1534_s25 }
 0x30b   :  { %769 = vrot.lane.b32.xlu1 %v739_v6, %s1529_s20  ;;  %833 = vrot.lane.b32.xlu0 %v738_v4, %s1531_s22 }
 0x30c   :  { %925 = vrot.lane.b32.xlu2 %v740_v7, %s1533_s24 }
 0x313   :  { %835 = vrot.lane.b32.xlu1 %v739_v6, %s1531_s22  ;;  %743 = vrot.lane.b32.xlu0 %v738_v4, %s1528_s19 }
 0x314   :  { %771 = vrot.lane.b32.xlu2 %v740_v7, %s1529_s20 }
 0x31b   :  { %745 = vrot.lane.b32.xlu1 %v739_v6, %s1528_s19  ;;  %809 = vrot.lane.b32.xlu0 %v738_v4, %s1530_s21 }
 0x31c   :  { %837 = vrot.lane.b32.xlu2 %v740_v7, %s1531_s22 }
 0x323   :  { %811 = vrot.lane.b32.xlu1 %v739_v6, %s1530_s21  ;;  %987 = vrot.lane.b32.xlu0 %v738_v4, %s1535_s26  ;;  %v788_v6 = vrot.slane %v780_v2, 4  ;;  %v843_v2 = vld [vmem:[%s2448_s3 + $0x20] sm:$0xf0] }
 0x324   :  { %747 = vrot.lane.b32.xlu2 %v740_v7, %s1528_s19 }
 0x32b   :  { %879 = vrot.lane.b32.xlu1 %v738_v4, %s1532_s23  ;;  %921 = vrot.lane.b32.xlu0 %v738_v4, %s1533_s24 }
 0x32c   :  { %813 = vrot.lane.b32.xlu2 %v740_v7, %s1530_s21 }
 0x333   :  { %765 = vrot.lane.b32.xlu1 %v737_v3, %s1529_s20  ;;  %741 = vrot.lane.b32.xlu0 %v737_v3, %s1528_s19 }
 0x334   :  { %945 = vrot.lane.b32.xlu2 %v738_v4, %s1534_s25  ;;  %v787_v4 = vrot.slane %v779_v0, 4 }
 0x33b   :  { %807 = vrot.lane.b32.xlu1 %v737_v3, %s1530_s21 }
 0x33c   :  { %831 = vrot.lane.b32.xlu2 %v737_v3, %s1531_s22 }
 0x346   :  { %v2055_v10 = vpop.permute.xlu2 %985 }
 0x34e   :  { %v992_v49 = vpop.permute.xlu2 %991 }
 0x34f   :  { %v996_v13 = vsel %vm386_vm7, %v992_v49, %v2055_v10 }
 0x350   :  { %v1004_v39 = vmul.f32 %v1000_v12, %v996_v13  ;;  %v845_v12 = vld [vmem:[%s2448_s3 + $0x30] sm:$0xf0] }
 0x356   :  { %v884_v11 = vpop.permute.xlu2 %883 }
 0x35d   :  { %v2066_v14 = vpop.permute.xlu1 %989  ;;  %v2068_v16 = vpop.permute.xlu0 %877 }
 0x35e   :  { %v993_v17 = vsel %vm386_vm7, %v2066_v14, %v992_v49  ;;  %v950_v57 = vpop.permute.xlu2 %949  ;;  %v888_v28 = vsel %vm242_vm4, %v884_v11, %v2068_v16 }
 0x35f   :  { %v1003_v22 = vmul.f32 %v999_v45, %v993_v17  ;;  %v908_v32 = vmul.f32 %v900_v26, %v888_v28  ;;  %v846_v17 = vld [vmem:[%s2448_s3 + $0x38] sm:$0xf0] }
 0x361   :  { %v1006_v25 = vpack.c.bf16 %v1004_v39, %v1003_v22  ;;  %v853_v39 = vrot.slane %v845_v12, 4  ;;  %v851_v12 = vrot.slane %v843_v2, 4 }
 0x363   :  { %1008 = vst [vmem:[#allocation2 + $0x48] sm:$0x33] %v1006_v25 }
 0x365   :  { %v2082_v29 = vpop.permute.xlu1 %881  ;;  %v2084_v20 = vpop.permute.xlu0 %943 }
 0x366   :  { %v885_v21 = vsel %vm242_vm4, %v2082_v29, %v884_v11  ;;  %v926_v30 = vpop.permute.xlu2 %925  ;;  %v954_v51 = vsel %vm332_vm6, %v950_v57, %v2084_v20 }
 0x367   :  { %v907_v56 = vmul.f32 %v899_v27, %v885_v21  ;;  %v974_v54 = vmul.f32 %v966_v40, %v954_v51  ;;  %v854_v27 = vrot.slane %v846_v17, 4  ;;  %v955_v40 = vld [vmem:[%s2448_s3 + $0x60] sm:$0xf0] }
 0x369   :  { %v910_v37 = vpack.c.bf16 %v908_v32, %v907_v56 }
 0x36a   :  { %v1470_v42 = vld [vmem:[#allocation2 + $0x48] sm:$0xf]  ;;  %v1501_v31 = vld [vmem:[#allocation2 + $0x4c] sm:$0xf] }
 0x36b   :  { %v914_v44 = vrot.slane %v910_v37, 6  ;;  %v1471_v48 = vor.u32 %v1503_v35, %v1470_v42  ;;  %v1475_v50 = vor.u32 %v1501_v31, %v1472_v36  ;;  %v956_v42 = vld [vmem:[%s2448_s3 + $0x68] sm:$0xf0] }
 0x36d   :  { %918 = vst [vmem:[#allocation2 + $0x28] sm:$0xcc] %v914_v44  ;;  %v2098_v1 = vpop.permute.xlu1 %947  ;;  %v2100_v43 = vpop.permute.xlu0 %919  ;;  %1117 = vmatpush.bf16.msrb.mxu2 %v1471_v48  ;;  %1130 = vmatpush.bf16.msrb.mxu3 %v1475_v50  ;;  %v755_v44 = vld [vmem:[%s2448_s3 + $0x10] sm:$0xf]  ;;  %v963_v48 = vrot.slane %v955_v40, 4  ;;  %v964_v50 = vrot.slane %v956_v42, 4 }
 0x36e   :  { %v951_v52 = vsel %vm332_vm6, %v2098_v1, %v950_v57  ;;  %v2105_v53 = vpop.permute.xlu2 %771  ;;  %v930_v34 = vsel %vm296_vm5, %v926_v30, %v2100_v43 }
 0x36f   :  { %v973_v55 = vmul.f32 %v965_v46, %v951_v52  ;;  %v938_v18 = vmul.f32 %v934_v5, %v930_v34  ;;  %v756_v46 = vld [vmem:[%s2448_s3 + $0x18] sm:$0xf] }
 0x371   :  { %v976_v59 = vpack.c.bf16 %v974_v54, %v973_v55 }
 0x373   :  { %v980_v60 = vrot.slane %v976_v59, 6 }
 0x374   :  { %v1454_v22 = vld [vmem:[#allocation2 + $0x28] sm:$0xf]  ;;  %v1497_v24 = vld [vmem:[#allocation2 + $0x2c] sm:$0xf] }
 0x375   :  { %984 = vst [vmem:[#allocation2 + $0x38] sm:$0xcc] %v980_v60  ;;  %v2116_v47 = vpop.permute.xlu1 %923  ;;  %v2118_v38 = vpop.permute.xlu0 %767 }
 0x376   :  { %v927_v62 = vsel %vm296_vm5, %v2116_v47, %v926_v30  ;;  %v2123_v63 = vpop.permute.xlu2 %837 }
 0x377   :  { %v937_v19 = vmul.f32 %v933_v61, %v927_v62 }
 0x379   :  { %v940_v3 = vpack.c.bf16 %v938_v18, %v937_v19 }
 0x37b   :  { %942 = vst [vmem:[#allocation2 + $0x38] sm:$0x33] %v940_v3  ;;  %v844_v3 = vld [vmem:[%s2448_s3 + $0x28] sm:$0xf0] }
 0x37d   :  { %v770_v7 = vpop.permute.xlu1 %769  ;;  %v2131_v8 = vpop.permute.xlu0 %833 }
 0x37e   :  { %v773_v9 = vsel %vm83_vm1, %v770_v7, %v2105_v53  ;;  %v774_v49 = vsel %vm83_vm1, %v2118_v38, %v770_v7  ;;  %v2139_v11 = vpop.permute.xlu2 %747  ;;  %v998_v7 = vld [vmem:[%s2448_s3 + $0x88] sm:$0xf] }
 0x37f   :  { %v795_v13 = vmul.f32 %v787_v4, %v774_v49  ;;  %v796_v45 = vmul.f32 %v788_v6, %v773_v9  ;;  %v997_v6 = vld [vmem:[%s2448_s3 + $0x80] sm:$0xf] }
 0x381   :  { %v798_v57 = vpack.c.bf16 %v796_v45, %v795_v13  ;;  %v852_v13 = vrot.slane %v844_v3, 4 }
 0x382   :  { %v1499_v23 = vld [vmem:[#allocation2 + $0x34] sm:$0xf0]  ;;  %v1456_v25 = vld [vmem:[#allocation2 + $0x38] sm:$0xf0] }
 0x383   :  { %v802_v26 = vrot.slane %v798_v57, 6  ;;  %v1455_v28 = vor.u32 %v1499_v23, %v1454_v22  ;;  %v1459_v21 = vor.u32 %v1497_v24, %v1456_v25 }
 0x385   :  { %806 = vst [vmem:[#allocation2 + $0x8] sm:$0xcc] %v802_v26  ;;  %v836_v30 = vpop.permute.xlu1 %835  ;;  %v2147_v32 = vpop.permute.xlu0 %743  ;;  %1118 = vmatpush.bf16.msrb.mxu2 %v1455_v28  ;;  %1131 = vmatpush.bf16.msrb.mxu3 %v1459_v21 }
 0x386   :  { %v839_v56 = vsel %vm173_vm3, %v836_v30, %v2123_v63  ;;  %v840_v15 = vsel %vm173_vm3, %v2131_v8, %v836_v30  ;;  %v2155_v33 = vpop.permute.xlu2 %813 }
 0x387   :  { %v861_v35 = vmul.f32 %v853_v39, %v840_v15  ;;  %v862_v36 = vmul.f32 %v854_v27, %v839_v56 }
 0x389   :  { %v864_v37 = vpack.c.bf16 %v862_v36, %v861_v35 }
 0x38b   :  { %v868_v31 = vrot.slane %v864_v37, 6  ;;  %v932_v37 = vld [vmem:[%s2448_s3 + $0x68] sm:$0xf] }
 0x38d   :  { %872 = vst [vmem:[#allocation2 + $0x18] sm:$0xcc] %v868_v31  ;;  %v746_v51 = vpop.permute.xlu1 %745  ;;  %v2169_v52 = vpop.permute.xlu0 %809 }
 0x38e   :  { %v749_v54 = vsel %vm47_vm0, %v746_v51, %v2139_v11  ;;  %v750_v55 = vsel %vm47_vm0, %v2147_v32, %v746_v51  ;;  %v946_v59 = vpop.permute.xlu2 %945 }
 0x38f   :  { %v759_v60 = vmul.f32 %v755_v44, %v750_v55  ;;  %v760_v5 = vmul.f32 %v756_v46, %v749_v54  ;;  %v952_v34 = vsel %vm332_vm6, %v946_v59, %v2098_v1  ;;  %v953_v61 = vsel %vm332_vm6, %v2084_v20, %v946_v59  ;;  %v821_v1 = vld [vmem:[%s2448_s3 + $0x30] sm:$0xf]  ;;  %v822_v20 = vld [vmem:[%s2448_s3 + $0x38] sm:$0xf]  ;;  %v777_v44 = vld [vmem:[%s2448_s3] sm:$0xf0] }
 0x390   :  { %v971_v62 = vmul.f32 %v963_v48, %v953_v61  ;;  %v972_v18 = vmul.f32 %v964_v50, %v952_v34  ;;  %v1502_v61 = vld [vmem:[#allocation2 + $0x4c] sm:$0xf0] }
 0x391   :  { %v762_v19 = vpack.c.bf16 %v760_v5, %v759_v60  ;;  %v785_v5 = vrot.slane %v777_v44, 4 }
 0x392   :  { %v975_v0 = vpack.c.bf16 %v972_v18, %v971_v62  ;;  %v1464_v62 = vld [vmem:[#allocation2 + $0x50] sm:$0xf0] }
 0x393   :  { %764 = vst [vmem:[#allocation2 + $0x8] sm:$0x33] %v762_v19 }
 0x394   :  { %v979_v4 = vrot.slane %v975_v0, 6 }
 0x395   :  { %v812_v9 = vpop.permute.xlu1 %811  ;;  %v988_v49 = vpop.permute.xlu0 %987 }
 0x396   :  { %983 = vst [vmem:[#allocation2 + $0x30] sm:$0xcc] %v979_v4  ;;  %v815_v45 = vsel %vm137_vm2, %v812_v9, %v2155_v33  ;;  %v816_v17 = vsel %vm137_vm2, %v2169_v52, %v812_v9  ;;  %v994_v57 = vsel %vm386_vm7, %v988_v49, %v2066_v14  ;;  %v995_v39 = vsel %vm386_vm7, %v2055_v10, %v988_v49  ;;  %v832_v22 = vpop.permute.xlu2 %831  ;;  %v889_v14 = vld [vmem:[%s2448_s3 + $0x40] sm:$0xf0]  ;;  %v890_v10 = vld [vmem:[%s2448_s3 + $0x48] sm:$0xf0] }
 0x397   :  { %v825_v23 = vmul.f32 %v821_v1, %v816_v17  ;;  %v826_v24 = vmul.f32 %v822_v20, %v815_v45  ;;  %v1001_v25 = vmul.f32 %v997_v6, %v995_v39  ;;  %v1002_v26 = vmul.f32 %v998_v7, %v994_v57  ;;  %v753_v4 = vld [vmem:[%s2448_s3] sm:$0xf]  ;;  %v754_v6 = vld [vmem:[%s2448_s3 + $0x8] sm:$0xf] }
 0x398   :  { %v841_v27 = vsel %vm173_vm3, %v832_v22, %v2131_v8  ;;  %v842_v28 = vsel %vm173_vm3, %v2123_v63, %v832_v22  ;;  %v897_v36 = vrot.slane %v889_v14, 4  ;;  %v898_v8 = vrot.slane %v890_v10, 4  ;;  %v931_v63 = vld [vmem:[%s2448_s3 + $0x60] sm:$0xf] }
 0x399   :  { %v828_v21 = vpack.c.bf16 %v826_v24, %v825_v23  ;;  %v1005_v30 = vpack.c.bf16 %v1002_v26, %v1001_v25  ;;  %v859_v56 = vmul.f32 %v851_v12, %v842_v28  ;;  %v860_v15 = vmul.f32 %v852_v13, %v841_v27  ;;  %v2258_v49 = vld [vmem:[%s2449_s1 + $0x2] sm:$0x3] }
 0x39a   :  { %v1438_v18 = vld [vmem:[#allocation2 + $0x8] sm:$0xf]  ;;  %v1493_v19 = vld [vmem:[#allocation2 + $0xc] sm:$0xf] }
 0x39b   :  { %830 = vst [vmem:[#allocation2 + $0x18] sm:$0x33] %v828_v21  ;;  %v863_v35 = vpack.c.bf16 %v860_v15, %v859_v56 }
 0x39c   :  { %1007 = vst [vmem:[#allocation2 + $0x40] sm:$0x33] %v1005_v30 }
 0x39d   :  { %v867_v40 = vrot.slane %v863_v35, 6  ;;  %v880_v42 = vpop.permute.xlu1 %879  ;;  %v922_v31 = vpop.permute.xlu0 %921 }
 0x39e   :  { %v886_v46 = vsel %vm242_vm4, %v880_v42, %v2082_v29  ;;  %v887_v48 = vsel %vm242_vm4, %v2068_v16, %v880_v42  ;;  %v928_v50 = vsel %vm296_vm5, %v922_v31, %v2116_v47  ;;  %v929_v51 = vsel %vm296_vm5, %v2100_v43, %v922_v31  ;;  %v778_v29 = vld [vmem:[%s2448_s3 + $0x8] sm:$0xf0] }
 0x39f   :  { %871 = vst [vmem:[#allocation2 + $0x10] sm:$0xcc] %v867_v40  ;;  %v905_v54 = vmul.f32 %v897_v36, %v887_v48  ;;  %v906_v55 = vmul.f32 %v898_v8, %v886_v46  ;;  %v935_v59 = vmul.f32 %v931_v63, %v929_v51  ;;  %v936_v60 = vmul.f32 %v932_v37, %v928_v50 }
 0x3a0   :  { %v786_v43 = vrot.slane %v778_v29, 4 }
 0x3a1   :  { %v909_v34 = vpack.c.bf16 %v906_v55, %v905_v54  ;;  %v939_v16 = vpack.c.bf16 %v936_v60, %v935_v59 }
 0x3a2   :  { %v1495_v47 = vld [vmem:[#allocation2 + $0x14] sm:$0xf0]  ;;  %v1440_v0 = vld [vmem:[#allocation2 + $0x18] sm:$0xf0] }
 0x3a3   :  { %v913_v2 = vrot.slane %v909_v34, 6  ;;  %941 = vst [vmem:[#allocation2 + $0x30] sm:$0x33] %v939_v16  ;;  %v1462_v3 = vld [vmem:[#allocation2 + $0x40] sm:$0xf]  ;;  %v1439_v1 = vor.u32 %v1495_v47, %v1438_v18  ;;  %v1443_v20 = vor.u32 %v1493_v19, %v1440_v0 }
 0x3a4   :  { %v1463_v7 = vor.u32 %v1502_v61, %v1462_v3  ;;  %v1500_v9 = vld [vmem:[#allocation2 + $0x44] sm:$0xf] }
 0x3a5   :  { %917 = vst [vmem:[#allocation2 + $0x20] sm:$0xcc] %v913_v2  ;;  %v766_v12 = vpop.permute.xlu1 %765  ;;  %v742_v13 = vpop.permute.xlu0 %741  ;;  %v1467_v45 = vor.u32 %v1500_v9, %v1464_v62  ;;  %1119 = vmatpush.bf16.msrb.mxu2 %v1439_v1  ;;  %1132 = vmatpush.bf16.msrb.mxu3 %v1443_v20 }
 0x3a6   :  { %v775_v17 = vsel %vm83_vm1, %v766_v12, %v2118_v38  ;;  %v776_v57 = vsel %vm83_vm1, %v2105_v53, %v766_v12  ;;  %v751_v39 = vsel %vm47_vm0, %v742_v13, %v2147_v32  ;;  %v752_v22 = vsel %vm47_vm0, %v2139_v11, %v742_v13  ;;  %1091 = vmatpush.bf16.msrb.mxu0 %v1463_v7  ;;  %v819_v11 = vld [vmem:[%s2448_s3 + $0x20] sm:$0xf]  ;;  %v820_v32 = vld [vmem:[%s2448_s3 + $0x28] sm:$0xf]  ;;  %s1539_s3 = smov 2  }
 0x3a7   :  { %v793_v23 = vmul.f32 %v785_v5, %v776_v57  ;;  %v794_v24 = vmul.f32 %v786_v43, %v775_v17  ;;  %v757_v25 = vmul.f32 %v753_v4, %v752_v22  ;;  %v758_v26 = vmul.f32 %v754_v6, %v751_v39  ;;  %1104 = vmatpush.bf16.msrb.mxu1 %v1467_v45 }
 0x3a8   :  { %1478 = vmatmul.msk.bf16.vlgmr.msrb.gmra.mxu2 %vm476_vm8, %v2258_v49  ;;  %1479 = vmatmul.msk.bf16.vlgmr.msrb.gmra.mxu3 %vm476_vm8, %v2258_v49 }
 0x3a9   :  { %v797_v53 = vpack.c.bf16 %v794_v24, %v793_v23  ;;  %v761_v38 = vpack.c.bf16 %v758_v26, %v757_v25  ;;  %1178 = vmatpush.msra.mxu2 %v1537_v58  ;;  %1198 = vmatpush.msra.mxu3 %v1537_v58  ;;  %v1540_v24 = vmov 2   ;;  %v1306_v25 = vld [vmem:[%s2450_s2] sm:$0xf] }
 0x3aa   :  { %v1498_v28 = vld [vmem:[#allocation2 + $0x2c] sm:$0xf0]  ;;  %v1448_v21 = vld [vmem:[#allocation2 + $0x30] sm:$0xf0]  ;;  %1522 = vset.pattern.permute.xlu2 %v1540_v24 }
 0x3ab   :  { %v801_v27 = vrot.slane %v797_v53, 6  ;;  %763 = vst [vmem:[#allocation2] sm:$0x33] %v761_v38  ;;  %1179 = vmatpush.msra.mxu2 %v1537_v58  ;;  %1199 = vmatpush.msra.mxu3 %v1537_v58 }
 0x3ac   :  { %v1446_v14 = vld [vmem:[#allocation2 + $0x20] sm:$0xf]  ;;  %v1496_v10 = vld [vmem:[#allocation2 + $0x24] sm:$0xf] }
 0x3ad   :  { %805 = vst [vmem:[#allocation2] sm:$0xcc] %v801_v27  ;;  %v808_v30 = vpop.permute.xlu1 %807  ;;  %v1447_v56 = vor.u32 %v1498_v28, %v1446_v14  ;;  %v1451_v15 = vor.u32 %v1496_v10, %v1448_v21  ;;  %1180 = vmatpush.msra.mxu2 %v1537_v58  ;;  %1200 = vmatpush.msra.mxu3 %v1537_v58 }
 0x3ae   :  { %v817_v35 = vsel %vm137_vm2, %v808_v30, %v2169_v52  ;;  %v818_v36 = vsel %vm137_vm2, %v2155_v33, %v808_v30 }
 0x3af   :  { %v823_v8 = vmul.f32 %v819_v11, %v818_v36  ;;  %v824_v63 = vmul.f32 %v820_v32, %v817_v35  ;;  %1092 = vmatpush.bf16.msrb.mxu0 %v1447_v56  ;;  %1105 = vmatpush.bf16.msrb.mxu1 %v1451_v15  ;;  %v1543_v32 = vmov 3  }
 0x3b0   :  { %1181 = vmatpush.msra.mxu2 %v1537_v58  ;;  %1201 = vmatpush.msra.mxu3 %v1537_v58 }
 0x3b1   :  { %v827_v37 = vpack.c.bf16 %v824_v63, %v823_v8  ;;  %1523 = vset.pattern.permute.xlu0 %v1543_v32 }
 0x3b2   :  { %1182 = vmatpush.msra.mxu2 %v1537_v58  ;;  %1202 = vmatpush.msra.mxu3 %v1537_v58 }
 0x3b3   :  { %829 = vst [vmem:[#allocation2 + $0x10] sm:$0x33] %v827_v37 }
 0x3b4   :  { %1183 = vmatpush.msra.mxu2 %v1537_v58  ;;  %1203 = vmatpush.msra.mxu3 %v1537_v58  ;;  %v1430_v41 = vld [vmem:[#allocation2] sm:$0xf]  ;;  %v1492_v52 = vld [vmem:[#allocation2 + $0x4] sm:$0xf] }
 0x3b6   :  { %1184 = vmatpush.msra.mxu2 %v1537_v58  ;;  %1204 = vmatpush.msra.mxu3 %v1537_v58 }
 0x3b8   :  { %1185 = vmatpush.msra.mxu2 %v1537_v58  ;;  %1205 = vmatpush.msra.mxu3 %v1537_v58 }
 0x3ba   :  { %v1494_v33 = vld [vmem:[#allocation2 + $0xc] sm:$0xf0]  ;;  %v1432_v40 = vld [vmem:[#allocation2 + $0x10] sm:$0xf0]  ;;  %1186 = vmatpush.msra.mxu2 %v1537_v58  ;;  %1206 = vmatpush.msra.mxu3 %v1537_v58 }
 0x3bb   :  { %v1431_v42 = vor.u32 %v1494_v33, %v1430_v41  ;;  %v1435_v31 = vor.u32 %v1492_v52, %v1432_v40  ;;  %v1354_v33 = vld [vmem:[%s2447_s0] sm:$0xff]  ;;  %v1355_v52 = vld [vmem:[%s2447_s0 + $0x8] sm:$0xff] }
 0x3bc   :  { %1187 = vmatpush.msra.mxu2 %v1537_v58  ;;  %1207 = vmatpush.msra.mxu3 %v1537_v58 }
 0x3bd   :  { %1093 = vmatpush.bf16.msrb.mxu0 %v1431_v42  ;;  %1106 = vmatpush.bf16.msrb.mxu1 %v1435_v31 }
 0x3be   :  { %1188 = vmatpush.msra.mxu2 %v1537_v58  ;;  %1208 = vmatpush.msra.mxu3 %v1537_v58 }
 0x3c0   :  { %1476 = vmatmul.msk.bf16.vlgmr.msrb.gmra.mxu0 %vm476_vm8, %v2258_v49  ;;  %1477 = vmatmul.msk.bf16.vlgmr.msrb.gmra.mxu1 %vm476_vm8, %v2258_v49 }
 0x3c1   :  { %1138 = vmatpush.msra.mxu0 %v1537_v58  ;;  %1158 = vmatpush.msra.mxu1 %v1537_v58 }
 0x3c2   :  { %1189 = vmatpush.msra.mxu2 %v1537_v58  ;;  %1209 = vmatpush.msra.mxu3 %v1537_v58 }
 0x3c3   :  { %1139 = vmatpush.msra.mxu0 %v1537_v58  ;;  %1159 = vmatpush.msra.mxu1 %v1537_v58 }
 0x3c4   :  { %1190 = vmatpush.msra.mxu2 %v1537_v58  ;;  %1210 = vmatpush.msra.mxu3 %v1537_v58 }
 0x3c5   :  { %1140 = vmatpush.msra.mxu0 %v1537_v58  ;;  %1160 = vmatpush.msra.mxu1 %v1537_v58 }
 0x3c6   :  { %1191 = vmatpush.msra.mxu2 %v1537_v58  ;;  %1211 = vmatpush.msra.mxu3 %v1537_v58 }
 0x3c7   :  { %1141 = vmatpush.msra.mxu0 %v1537_v58  ;;  %1161 = vmatpush.msra.mxu1 %v1537_v58 }
 0x3c8   :  { %1192 = vmatpush.msra.mxu2 %v1537_v58  ;;  %1212 = vmatpush.msra.mxu3 %v1537_v58 }
 0x3c9   :  { %1142 = vmatpush.msra.mxu0 %v1537_v58  ;;  %1162 = vmatpush.msra.mxu1 %v1537_v58 }
 0x3ca   :  { %1193 = vmatpush.msra.mxu2 %v1537_v58  ;;  %1213 = vmatpush.msra.mxu3 %v1537_v58 }
 0x3cb   :  { %1143 = vmatpush.msra.mxu0 %v1537_v58  ;;  %1163 = vmatpush.msra.mxu1 %v1537_v58 }
 0x3cc   :  { %1263 = vmatpush.msrb.mxu2 %v1537_v58  ;;  %1283 = vmatpush.msrb.mxu3 %v1537_v58 }
 0x3cd   :  { %1144 = vmatpush.msra.mxu0 %v1537_v58  ;;  %1164 = vmatpush.msra.mxu1 %v1537_v58 }
 0x3ce   :  { %1264 = vmatpush.msrb.mxu2 %v1537_v58  ;;  %1284 = vmatpush.msrb.mxu3 %v1537_v58 }
 0x3cf   :  { %1145 = vmatpush.msra.mxu0 %v1537_v58  ;;  %1165 = vmatpush.msra.mxu1 %v1537_v58 }
 0x3d0   :  { %1265 = vmatpush.msrb.mxu2 %v1537_v58  ;;  %1285 = vmatpush.msrb.mxu3 %v1537_v58 }
 0x3d1   :  { %1146 = vmatpush.msra.mxu0 %v1537_v58  ;;  %1166 = vmatpush.msra.mxu1 %v1537_v58 }
 0x3d2   :  { %1266 = vmatpush.msrb.mxu2 %v1537_v58  ;;  %1286 = vmatpush.msrb.mxu3 %v1537_v58 }
 0x3d3   :  { %1147 = vmatpush.msra.mxu0 %v1537_v58  ;;  %1167 = vmatpush.msra.mxu1 %v1537_v58 }
 0x3d4   :  { %1267 = vmatpush.msrb.mxu2 %v1537_v58  ;;  %1287 = vmatpush.msrb.mxu3 %v1537_v58 }
 0x3d5   :  { %1148 = vmatpush.msra.mxu0 %v1537_v58  ;;  %1168 = vmatpush.msra.mxu1 %v1537_v58 }
 0x3d6   :  { %1268 = vmatpush.msrb.mxu2 %v1537_v58  ;;  %1288 = vmatpush.msrb.mxu3 %v1537_v58 }
 0x3d7   :  { %1149 = vmatpush.msra.mxu0 %v1537_v58  ;;  %1169 = vmatpush.msra.mxu1 %v1537_v58 }
 0x3d8   :  { %1269 = vmatpush.msrb.mxu2 %v1537_v58  ;;  %1289 = vmatpush.msrb.mxu3 %v1537_v58 }
 0x3d9   :  { %1150 = vmatpush.msra.mxu0 %v1537_v58  ;;  %1170 = vmatpush.msra.mxu1 %v1537_v58 }
 0x3da   :  { %1270 = vmatpush.msrb.mxu2 %v1537_v58  ;;  %1290 = vmatpush.msrb.mxu3 %v1537_v58 }
 0x3db   :  { %1151 = vmatpush.msra.mxu0 %v1537_v58  ;;  %1171 = vmatpush.msra.mxu1 %v1537_v58 }
 0x3dc   :  { %1271 = vmatpush.msrb.mxu2 %v1537_v58  ;;  %1291 = vmatpush.msrb.mxu3 %v1537_v58 }
 0x3dd   :  { %1152 = vmatpush.msra.mxu0 %v1537_v58  ;;  %1172 = vmatpush.msra.mxu1 %v1537_v58 }
 0x3de   :  { %1272 = vmatpush.msrb.mxu2 %v1537_v58  ;;  %1292 = vmatpush.msrb.mxu3 %v1537_v58 }
 0x3df   :  { %1153 = vmatpush.msra.mxu0 %v1537_v58  ;;  %1173 = vmatpush.msra.mxu1 %v1537_v58 }
 0x3e0   :  { %1273 = vmatpush.msrb.mxu2 %v1537_v58  ;;  %1293 = vmatpush.msrb.mxu3 %v1537_v58 }
 0x3e1   :  { %1223 = vmatpush.msrb.mxu0 %v1537_v58  ;;  %1243 = vmatpush.msrb.mxu1 %v1537_v58 }
 0x3e2   :  { %1274 = vmatpush.msrb.mxu2 %v1537_v58  ;;  %1294 = vmatpush.msrb.mxu3 %v1537_v58 }
 0x3e3   :  { %1224 = vmatpush.msrb.mxu0 %v1537_v58  ;;  %1244 = vmatpush.msrb.mxu1 %v1537_v58 }
 0x3e4   :  { %1275 = vmatpush.msrb.mxu2 %v1537_v58  ;;  %1295 = vmatpush.msrb.mxu3 %v1537_v58 }
 0x3e5   :  { %1225 = vmatpush.msrb.mxu0 %v1537_v58  ;;  %1245 = vmatpush.msrb.mxu1 %v1537_v58 }
 0x3e6   :  { %1276 = vmatpush.msrb.mxu2 %v1537_v58  ;;  %1296 = vmatpush.msrb.mxu3 %v1537_v58 }
 0x3e7   :  { %1226 = vmatpush.msrb.mxu0 %v1537_v58  ;;  %1246 = vmatpush.msrb.mxu1 %v1537_v58 }
 0x3e8   :  { %1277 = vmatpush.msrb.mxu2 %v1537_v58  ;;  %1297 = vmatpush.msrb.mxu3 %v1537_v58 }
 0x3e9   :  { %1227 = vmatpush.msrb.mxu0 %v1537_v58  ;;  %1247 = vmatpush.msrb.mxu1 %v1537_v58 }
 0x3ea   :  { %1278 = vmatpush.msrb.mxu2 %v1537_v58  ;;  %1298 = vmatpush.msrb.mxu3 %v1537_v58 }
 0x3eb   :  { %1228 = vmatpush.msrb.mxu0 %v1537_v58  ;;  %1248 = vmatpush.msrb.mxu1 %v1537_v58 }
 0x3ed   :  { %1229 = vmatpush.msrb.mxu0 %v1537_v58  ;;  %1249 = vmatpush.msrb.mxu1 %v1537_v58 }
 0x3ef   :  { %1230 = vmatpush.msrb.mxu0 %v1537_v58  ;;  %1250 = vmatpush.msrb.mxu1 %v1537_v58 }
 0x3f1   :  { %1231 = vmatpush.msrb.mxu0 %v1537_v58  ;;  %1251 = vmatpush.msrb.mxu1 %v1537_v58 }
 0x3f3   :  { %1232 = vmatpush.msrb.mxu0 %v1537_v58  ;;  %1252 = vmatpush.msrb.mxu1 %v1537_v58 }
 0x3f5   :  { %1233 = vmatpush.msrb.mxu0 %v1537_v58  ;;  %1253 = vmatpush.msrb.mxu1 %v1537_v58 }
 0x3f7   :  { %1234 = vmatpush.msrb.mxu0 %v1537_v58  ;;  %1254 = vmatpush.msrb.mxu1 %v1537_v58 }
 0x3f9   :  { %1235 = vmatpush.msrb.mxu0 %v1537_v58  ;;  %1255 = vmatpush.msrb.mxu1 %v1537_v58 }
 0x3fb   :  { %1236 = vmatpush.msrb.mxu0 %v1537_v58  ;;  %1256 = vmatpush.msrb.mxu1 %v1537_v58 }
 0x3fd   :  { %1237 = vmatpush.msrb.mxu0 %v1537_v58  ;;  %1257 = vmatpush.msrb.mxu1 %v1537_v58 }
 0x3ff   :  { %1238 = vmatpush.msrb.mxu0 %v1537_v58  ;;  %1258 = vmatpush.msrb.mxu1 %v1537_v58 }
 0x42b   :  { %v2420_v44 = vpop.f32.mrf.mxu2  ;;  %v2422_v46 = vpop.f32.mrf.mxu3 }
 0x42c   :  { %1194 = vmatmul.f32.vlgmr.msra.gmra.mxu2 %v2420_v44  ;;  %1214 = vmatmul.f32.vlgmr.msra.gmra.mxu3 %v2422_v46  ;;  %v1221_v48 = vmul.f32 %v2420_v44, %v2420_v44  ;;  %v1222_v50 = vmul.f32 %v2422_v46, %v2422_v46 }
 0x433   :  { %v1123_v51 = vpop.f32.mrf.mxu2  ;;  %v1136_v54 = vpop.f32.mrf.mxu3 }
 0x434   :  { %1279 = vmatmul.f32.vlgmr.msrb.gmra.mxu2 %v1221_v48  ;;  %1299 = vmatmul.f32.vlgmr.msrb.gmra.mxu3 %v1222_v50 }
 0x43d   :  { %v1095_v55 = vpop.f32.mrf.mxu0  ;;  %v1108_v58 = vpop.f32.mrf.mxu1 }
 0x43e   :  { %1154 = vmatmul.f32.vlgmr.msra.gmra.mxu0 %v1095_v55  ;;  %1174 = vmatmul.f32.vlgmr.msra.gmra.mxu1 %v1108_v58  ;;  %v1219_v59 = vmul.f32 %v1095_v55, %v1095_v55  ;;  %v1220_v60 = vmul.f32 %v1108_v58, %v1108_v58 }
 0x445   :  { %v1097_v29 = vpop.f32.mrf.mxu0  ;;  %v1110_v5 = vpop.f32.mrf.mxu1 }
 0x446   :  { %1239 = vmatmul.f32.vlgmr.msrb.gmra.mxu0 %v1219_v59  ;;  %1259 = vmatmul.f32.vlgmr.msrb.gmra.mxu1 %v1220_v60 }
 0x4af   :  { %v1195_v34 = vpop.f32.mrf.mxu2  ;;  %v1215_v18 = vpop.f32.mrf.mxu3 }
 0x4b7   :  { %v1280_v3 = vpop.f32.mrf.mxu2  ;;  %v1300_v4 = vpop.f32.mrf.mxu3 }
 0x4bb   :  { %v1155_v16 = vpop.f32.mrf.mxu0  ;;  %v1175_v61 = vpop.f32.mrf.mxu1 }
 0x4bc   :  { %v1176_v62 = vadd.f32 %v1175_v61, %v1155_v16 }
 0x4be   :  { %v1196_v47 = vadd.f32 %v1195_v34, %v1176_v62 }
 0x4c0   :  { %v1216_v19 = vadd.f32 %v1215_v18, %v1196_v47 }
 0x4c2   :  { %v1218_v1 = vmul.f32 0.001953125, %v1216_v19 }
 0x4c3   :  { %v1240_v0 = vpop.f32.mrf.mxu0  ;;  %v1260_v2 = vpop.f32.mrf.mxu1 }
 0x4c4   :  { %v1261_v43 = vadd.f32 %v1260_v2, %v1240_v0  ;;  %v1304_v7 = vmul.f32 %v1218_v1, %v1218_v1 }
 0x4c6   :  { %v1281_v20 = vadd.f32 %v1280_v3, %v1261_v43 }
 0x4c8   :  { %v1301_v6 = vadd.f32 %v1300_v4, %v1281_v20 }
 0x4ca   :  { %v1303_v9 = vmul.f32 0.001953125, %v1301_v6 }
 0x4cc   :  { %v1305_v49 = vsub.f32 %v1303_v9, %v1304_v7 }
 0x4ce   :  { %v1307_v12 = vadd.f32 1e-05, %v1305_v49 }
 0x4d0   :  { %1526 = vrsqrt.f32 %v1307_v12  ;;  %vm1314_vm13 = vweird.f32 %v1307_v12 }
 0x4d6   :  { %v1527_v13 = vpop.eup %1526 }
 0x4d7   :  { %v1309_v45 = vmul.f32 %v1527_v13, %v1307_v12  ;;  %vm1315_vm12 = vweird.f32 %v1527_v13 }
 0x4d8   :  { %vm1316_vm14 = vmor %vm1314_vm13, %vm1315_vm12 }
 0x4d9   :  { %v1310_v17 = vmul.f32 %v1527_v13, %v1309_v45 }
 0x4db   :  { %v1311_v57 = vmul.f32 0.5, %v1310_v17 }
 0x4dd   :  { %v1312_v39 = vsub.f32 1.5, %v1311_v57 }
 0x4df   :  { %v1313_v22 = vmul.f32 %v1527_v13, %v1312_v39 }
 0x4e1   :  { %v1317_v23 = vsel %vm1316_vm14, %v1527_v13, %v1313_v22 }
 0x4e2   :  { %1319 = vrot.lane.b32.xlu2 %v1317_v23, %s1539_s3 }
 0x53c   :  { %v1320_v26 = vpop.permute.xlu2 %1319 }
 0x53d   :  { %v1322_v53 = vmul.f32 %v1320_v26, %v1306_v25 }
 0x53f   :  { %1334 = vperm.xlu2 %1522, %v1322_v53   ;;  %1324 = vrot.lane.b32.xlu0 %v1322_v53, %s1541_s30 }
 0x599   :  { %v1335_v14 = vpop.permute.xlu2 %1334 }
 0x59a   :  { %v1337_v10 = vmul.f32 %v1335_v14, %v1095_v55  ;;  %v1338_v21 = vmul.f32 %v1335_v14, %v1108_v58  ;;  %v1339_v30 = vmul.f32 %v1335_v14, %v2420_v44  ;;  %v1340_v56 = vmul.f32 %v1335_v14, %v2422_v46 }
 0x5b1   :  { %v1325_v38 = vpop.permute.xlu0 %1324 }
 0x5b2   :  { %v1327_v11 = vmul.f32 %v1325_v38, %v1218_v1 }
 0x5b4   :  { %1329 = vrot.lane.b32.xlu1 %v1327_v11, %s1542_s5 }
 0x626   :  { %v1330_v27 = vpop.permute.xlu1 %1329 }
 0x627   :  { %v1332_v28 = vsub.f32 %v1306_v25, %v1330_v27 }
 0x629   :  { %1343 = vperm.xlu0 %1523, %v1332_v28  }
 0x69b   :  { %v1344_v15 = vpop.permute.xlu0 %1343 }
 0x69c   :  { %v1346_v35 = vadd.f32 %v1344_v15, %v1337_v10  ;;  %v1347_v36 = vadd.f32 %v1344_v15, %v1338_v21  ;;  %v1348_v8 = vadd.f32 %v1344_v15, %v1339_v30  ;;  %v1349_v63 = vadd.f32 %v1344_v15, %v1340_v56 }
 0x69e   :  { %v1351_v37 = vmax.f32 %v1347_v36, 0.0  ;;  %v1353_v41 = vmax.f32 %v1349_v63, 0.0  ;;  %v1350_v40 = vmax.f32 %v1346_v35, 0.0  ;;  %v1352_v42 = vmax.f32 %v1348_v8, 0.0 }
 0x6a0   :  { %v1360_v31 = vrot.slane %v1351_v37, 4  ;;  %v1361_v44 = vrot.slane %v1353_v41, 4 }
 0x6a2   :  { %v1363_v46 = vsel %vm1362_vm15, %v1350_v40, %v1360_v31  ;;  %v1364_v48 = vsel %vm1362_vm15, %v1352_v42, %v1361_v44 }
 0x6a3   :  { %v1367_v50 = vadd.f32 %v1363_v46, %v1354_v33  ;;  %v1368_v51 = vadd.f32 %v1364_v48, %v1355_v52 }
 0x6a5   :  { %1369 = vst [vmem:[%s2451_s4] sm:$0xff] %v1367_v50 }
 0x6a6   :  { %1370 = vst [vmem:[%s2451_s4 + $0x8] sm:$0xff] %v1368_v51 }

</bundles_post_ra>
